<compile_context>
chip_gen: v7x
topology: tpu7x:2x2x1
jax: 0.10.0
libtpu: 0.0.40
codegen_flags: <defaults>
</compile_context>

<pallas_src>
import functools

import jax
import jax.numpy as jnp
from jax.experimental import pallas as pl
from jax.experimental.pallas import tpu as pltpu


def _wseg2d_tile_kernel(p_ref, lbl_ref, stx_ref, sty_ref, triu_ref, tril_ref,
                        out_ref, *, eps: float):
    # p_ref:    [tc, H, W]   predict tile for classes [ci*tc, (ci+1)*tc)  (f32 or bf16)
    # lbl_ref:  [H, W]       integer labels for this batch element (int8/int32)
    # stx_ref:  [Cp, W]      precomputed label x-marginals (counts over H), all classes
    # sty_ref:  [Cp, H]      precomputed label y-marginals (counts over W), all classes
    # triu_ref: [W, W]       upper-triangular ones (cumsum along W, applied on the right)
    # tril_ref: [H, H]       lower-triangular ones (cumsum along H, applied on the left)
    # out_ref:  [8, 128]     lane-dense per-tile partial sums
    tc, h, w = p_ref.shape
    inv_w = 1.0 / float(w)

    p = p_ref[...]                                   # keep input dtype; accum is f32
    lbl = lbl_ref[...].astype(jnp.int32)

    ci = pl.program_id(1)
    cls = ci * tc + jax.lax.broadcasted_iota(jnp.int32, (tc, 1, 1), 0)
    mask = lbl[None, :, :] == cls                    # [tc, H, W] in-kernel one-hot mask
    pt = jnp.where(mask, p, 0.0)                     # p * t, stays in p.dtype

    # ---- x-marginals: sum over H (sublane axis) -> cheap VPU vreg adds ----------
    sp_x = jnp.sum(p, axis=1, dtype=jnp.float32)     # [tc, W]
    spt_x = jnp.sum(pt, axis=1, dtype=jnp.float32)   # [tc, W]
    st_x = stx_ref[pl.ds(ci * tc, tc), :]            # [tc, W] precomputed label counts

    # ---- y-marginals: sum over W (lane axis) done on the MXU --------------------
    # [tc*H, W] @ [W, 1] -> per-(class,row) sums; per-class columns are reassembled
    # with static sublane slices + a lane concat, giving the transposed layout
    # [H, tc] that feeds a plain lower-tri matmul for the H-cumsum (no relayouts).
    ones_col = jnp.ones((w, 1), dtype=p.dtype)
    rp = jnp.dot(p.reshape(tc * h, w), ones_col,
                 preferred_element_type=jnp.float32)           # [tc*H, 1]
    rpt = jnp.dot(pt.reshape(tc * h, w), ones_col,
                  preferred_element_type=jnp.float32)          # [tc*H, 1]
    spT = jnp.concatenate([rp[i * h:(i + 1) * h] for i in range(tc)], axis=1)    # [H, tc]
    sptT = jnp.concatenate([rpt[i * h:(i + 1) * h] for i in range(tc)], axis=1)  # [H, tc]
    stT = jnp.transpose(sty_ref[pl.ds(ci * tc, tc), :])                          # [H, tc]

    # background marginals derived algebraically:
    #   sum (1-p)(1-t) = size - sum p - sum t + sum p*t ;  sum (1-t) = size - sum t
    bgp_x = float(h) - sp_x - st_x + spt_x
    bgt_x = float(h) - st_x
    bgpT = float(w) - spT - stT + sptT
    bgtT = float(w) - stT

    # stacks: [0:tc]=fg_p, [tc:2tc]=fg_t, [2tc:3tc]=bg_p, [3tc:4tc]=bg_t
    mx = jnp.concatenate([spt_x, st_x, bgp_x, bgt_x], axis=0) * inv_w   # [4tc, W]
    myT = jnp.concatenate([sptT, stT, bgpT, bgtT], axis=1) * inv_w      # [H, 4tc]

    # fused cumsums as MXU matmuls; volumes read from the last cumsum entry
    cx = jnp.dot(mx, triu_ref[...], preferred_element_type=jnp.float32)    # [4tc, W]
    cyT = jnp.dot(tril_ref[...], myT, preferred_element_type=jnp.float32)  # [H, 4tc]

    vol = cx[:, w - 1:w] + eps                      # [4tc, 1]
    volT = cyT[h - 1:h, :] + eps                    # [1, 4tc] (same values, transposed)
    # reciprocal-then-multiply instead of per-element divides
    # (pl.reciprocal(..., approx=True) would move it to the EUP at ~1e-3 rel. cost)
    dx = cx * (1.0 / vol)
    dyT = cyT * (1.0 / volT)

    s1 = jnp.sum(jnp.abs(dx[0:tc] - dx[tc:2 * tc]))                       # fg, x
    s3 = jnp.sum(jnp.abs(dx[2 * tc:3 * tc] - dx[3 * tc:4 * tc]))          # bg, x
    s2 = jnp.sum(jnp.abs(dyT[:, 0:tc] - dyT[:, tc:2 * tc]))               # fg, y
    s4 = jnp.sum(jnp.abs(dyT[:, 2 * tc:3 * tc] - dyT[:, 3 * tc:4 * tc]))  # bg, y
    s5 = jnp.sum(jnp.abs(vol[2 * tc:3 * tc, :] - vol[3 * tc:4 * tc, :]))  # bg volumes

    r = jax.lax.broadcasted_iota(jnp.int32, (8, 128), 0)
    out = jnp.where(r == 0, s1, 0.0)
    out = jnp.where(r == 1, s2, out)
    out = jnp.where(r == 2, s3, out)
    out = jnp.where(r == 3, s4, out)
    out = jnp.where(r == 4, s5, out)
    out_ref[...] = out


def _upper_tri(n):
    i = jnp.arange(n, dtype=jnp.int32)[:, None]
    j = jnp.arange(n, dtype=jnp.int32)[None, :]
    return (i <= j).astype(jnp.float32)


def _lower_tri(n):
    i = jnp.arange(n, dtype=jnp.int32)[:, None]
    j = jnp.arange(n, dtype=jnp.int32)[None, :]
    return (i >= j).astype(jnp.float32)


def wseg2d_loss(predict, target, *, div_eps: float = 0.5, alpha: float = 1.0,
                class_block: int | None = None,
                cast_predict_to_bf16: bool = False,
                vmem_limit_bytes: int = 48 * 1024 * 1024):
    """predict: [N, C, H, W]; target: [N, H, W] / [N, 1, H, W] integer labels
    (or [N, C, H, W] one-hot, reduced to labels via argmax).

    cast_predict_to_bf16=True halves HBM traffic (recommended on v5e/v6e); the
    in-kernel accumulation stays f32, final loss changes at the ~1e-3 level."""
    n, c, h, w = predict.shape

    # glue: integer label map (the torch module's no_grad scatter one-hot is replaced
    # by wrapper-side label marginals + an in-kernel `labels == class_id` mask)
    if target.ndim == 4:
        if target.shape[1] == 1:
            labels = target[:, 0].astype(jnp.int32)
        else:
            # TODO(synk): same-shape *soft* one-hot targets are reduced to hard labels here.
            labels = jnp.argmax(target, axis=1).astype(jnp.int32)
    else:
        labels = target.astype(jnp.int32)

    p_in = predict.astype(jnp.bfloat16) if cast_predict_to_bf16 else predict
    in_bytes = jnp.dtype(p_in.dtype).itemsize

    # ---- class-tile sizing against the real per-step live set -------------------
    # per class per step: 2x double-buffered input tile + in-kernel temporaries
    # (pt, mask, reshape copies) ~ (4*in_bytes + 8) bytes/elt; tile-independent
    # residents: 2x both tri matrices (f32), 2x labels, slack.
    plane = h * w
    per_tc = plane * (4 * in_bytes + 8)
    overhead = 2 * 4 * (w * w + h * h) + 2 * 4 * plane + (1 << 20)
    budget = max(0, int(0.65 * vmem_limit_bytes) - overhead)
    if class_block is not None:
        tc = max(1, min(c, int(class_block)))
    else:
        tc = max(1, min(c, 128, budget // per_tc))
        # keep at least 2 grid steps so both v7x TensorCores get work
        if n * (-(-c // tc)) < 2 and c >= 2:
            tc = -(-c // 2)
    num_ct = -(-c // tc)          # cdiv
    c_pad = num_ct * tc
    if c_pad != c:
        # padded classes (p=0, never matching a label) contribute exactly 0 everywhere
        p_in = jnp.pad(p_in, ((0, 0), (0, c_pad - c), (0, 0), (0, 0)))

    # ---- precomputed target (label) marginals: the one-hot never enters the kernel
    class_ids = jnp.arange(c_pad, dtype=jnp.int32)
    oh = labels[:, :, :, None] == class_ids                              # [N,H,W,Cp]
    st_x = jnp.transpose(jnp.sum(oh, axis=1, dtype=jnp.float32), (0, 2, 1))  # [N,Cp,W]
    st_y = jnp.transpose(jnp.sum(oh, axis=2, dtype=jnp.float32), (0, 2, 1))  # [N,Cp,H]

    lbl_dtype = jnp.int8 if c_pad <= 127 else jnp.int32
    lbl_in = labels.astype(lbl_dtype)

    triu_w = _upper_tri(w)    # cumsum along W (applied on the right)
    tril_h = _lower_tri(h)    # cumsum along H (applied on the left)

    kernel = functools.partial(_wseg2d_tile_kernel, eps=float(div_eps))
    partials = pl.pallas_call(
        kernel,
        out_shape=jax.ShapeDtypeStruct((n, num_ct, 8, 128), jnp.float32),
        grid=(n, num_ct),
        in_specs=[
            pl.BlockSpec((None, tc, h, w), lambda i, j: (i, j, 0, 0)),   # predict tile
            pl.BlockSpec((None, h, w), lambda i, j: (i, 0, 0)),          # labels (per-batch resident)
            pl.BlockSpec((None, c_pad, w), lambda i, j: (i, 0, 0)),      # label x-marginals
            pl.BlockSpec((None, c_pad, h), lambda i, j: (i, 0, 0)),      # label y-marginals
            pl.BlockSpec((w, w), lambda i, j: (0, 0)),                   # upper tri (resident)
            pl.BlockSpec((h, h), lambda i, j: (0, 0)),                   # lower tri (resident)
        ],
        out_specs=pl.BlockSpec((None, None, 8, 128), lambda i, j: (i, j, 0, 0)),
        compiler_params=pltpu.CompilerParams(
            dimension_semantics=("parallel", "parallel"),
            vmem_limit_bytes=int(vmem_limit_bytes),
        ),
    )(p_in, lbl_in, st_x, st_y, triu_w, tril_h)

    # tiny final reduction in the wrapper (per-tile partial sums -> L1 means)
    sums = jnp.sum(partials[..., 0], axis=(0, 1))          # [8]
    denom_x = float(n * c * w)
    denom_y = float(n * c * h)
    denom_v = float(n * c)
    dist_loss = (sums[0] + sums[2]) / denom_x + (sums[1] + sums[3]) / denom_y
    regular_loss = sums[4] / denom_v
    return dist_loss + alpha * regular_loss


def _reference_loss(predict, labels, div_eps=0.5, alpha=1.0):
    """Pure-JAX reference mirroring the PyTorch forward, for verification."""
    predict = predict.astype(jnp.float32)
    n, c, h, w = predict.shape
    y = jax.nn.one_hot(labels.astype(jnp.int32), c, axis=1, dtype=jnp.float32)

    def get_dist(a):
        ax = jnp.sum(a, axis=2) / w               # [N, C, W]
        ay = jnp.sum(a, axis=3) / w               # [N, C, H]
        vol = jnp.sum(ax, axis=-1, keepdims=True) + div_eps
        return jnp.cumsum(ax, -1) / vol, jnp.cumsum(ay, -1) / vol, vol[..., 0]

    dpx, dpy, _ = get_dist(predict * y)
    dtx, dty, _ = get_dist(y)
    dist = jnp.mean(jnp.abs(dpx - dtx)) + jnp.mean(jnp.abs(dpy - dty))
    dpx, dpy, vp = get_dist((1 - predict) * (1 - y))
    dtx, dty, vt = get_dist(1 - y)
    dist = dist + jnp.mean(jnp.abs(dpx - dtx)) + jnp.mean(jnp.abs(dpy - dty))
    return dist + alpha * jnp.mean(jnp.abs(vp - vt))


if __name__ == "__main__":
    key = jax.random.PRNGKey(0)
    k1, k2, k3, k4, k5, k6 = jax.random.split(key, 6)

    # test 1: standard small shapes, exact f32 path
    N, C, H, W = 2, 4, 16, 16
    logits = jax.random.normal(k1, (N, C, H, W), dtype=jnp.float32)
    predict = jax.nn.softmax(logits, axis=1)
    labels = jax.random.randint(k2, (N, H, W), 0, C)

    loss = jax.block_until_ready(wseg2d_loss(predict, labels))
    ref = jax.block_until_ready(_reference_loss(predict, labels))
    assert jnp.isfinite(loss), "kernel produced non-finite loss"
    assert jnp.allclose(loss, ref, rtol=1e-5, atol=1e-5), (loss, ref)

    # test 2: C not divisible by the class tile (padded-class + multi-tile path)
    N2, C2 = 2, 5
    logits2 = jax.random.normal(k3, (N2, C2, H, W), dtype=jnp.float32)
    predict2 = jax.nn.softmax(logits2, axis=1)
    labels2 = jax.random.randint(k4, (N2, H, W), 0, C2)

    loss2 = jax.block_until_ready(wseg2d_loss(predict2, labels2, class_block=2))
    ref2 = jax.block_until_ready(_reference_loss(predict2, labels2))
    assert jnp.isfinite(loss2), "kernel produced non-finite loss (padded path)"
    assert jnp.allclose(loss2, ref2, rtol=1e-5, atol=1e-5), (loss2, ref2)

    # test 3: non-square spatial dims (two distinct triangular matrices)
    N3, C3, H3, W3 = 2, 3, 16, 32
    logits3 = jax.random.normal(k5, (N3, C3, H3, W3), dtype=jnp.float32)
    predict3 = jax.nn.softmax(logits3, axis=1)
    labels3 = jax.random.randint(k6, (N3, H3, W3), 0, C3)

    loss3 = jax.block_until_ready(wseg2d_loss(predict3, labels3))
    ref3 = jax.block_until_ready(_reference_loss(predict3, labels3))
    assert jnp.isfinite(loss3), "kernel produced non-finite loss (non-square path)"
    assert jnp.allclose(loss3, ref3, rtol=1e-5, atol=1e-5), (loss3, ref3)

    # test 4: bf16 predict input (halved HBM traffic path) vs f32 reference
    loss4 = jax.block_until_ready(
        wseg2d_loss(predict, labels, cast_predict_to_bf16=True))
    assert jnp.isfinite(loss4), "kernel produced non-finite loss (bf16 path)"
    assert jnp.allclose(loss4, ref, rtol=2e-2, atol=2e-2), (loss4, ref)

    print("KERNEL_OK")
</pallas_src>

<mosaic_0001>
module attributes {stable_mosaic.version = 11 : i64} {
  func.func @_wseg2d_tile_kernel(%arg0: i32, %arg1: i32, %arg2: memref<1x4x16x16xf32, #tpu.memory_space<vmem>>, %arg3: memref<1x16x16xi8, #tpu.memory_space<vmem>>, %arg4: memref<1x4x16xf32, #tpu.memory_space<vmem>>, %arg5: memref<1x4x16xf32, #tpu.memory_space<vmem>>, %arg6: memref<16x16xf32, #tpu.memory_space<vmem>>, %arg7: memref<16x16xf32, #tpu.memory_space<vmem>>, %arg8: memref<1x1x8x128xf32, #tpu.memory_space<vmem>>) attributes {dimension_semantics = [#tpu.dimension_semantics<parallel>, #tpu.dimension_semantics<parallel>], iteration_bounds = array<i64: 2, 1>, scalar_prefetch = 0 : i64, scratch_operands = 0 : i64, tpu.core_type = #tpu.core_type<tc>, window_params = [{transform_indices = @transform_0, window_bounds = array<i64: 1, 4, 16, 16>}, {transform_indices = @transform_1, window_bounds = array<i64: 1, 16, 16>}, {transform_indices = @transform_2, window_bounds = array<i64: 1, 4, 16>}, {transform_indices = @transform_3, window_bounds = array<i64: 1, 4, 16>}, {pipeline_mode = #tpu.pipeline_mode<synchronous>, transform_indices = @transform_4, window_bounds = array<i64: 16, 16>}, {pipeline_mode = #tpu.pipeline_mode<synchronous>, transform_indices = @transform_5, window_bounds = array<i64: 16, 16>}, {transform_indices = @transform_6, window_bounds = array<i64: 1, 1, 8, 128>}]} {
    %c0 = arith.constant 0 : index
    %c0_0 = arith.constant 0 : index
    %c0_1 = arith.constant 0 : index
    %c0_2 = arith.constant 0 : index
    %0 = vector.load %arg2[%c0, %c0_0, %c0_1, %c0_2] : memref<1x4x16x16xf32, #tpu.memory_space<vmem>>, vector<1x4x16x16xf32>
    %1 = vector.shape_cast %0 : vector<1x4x16x16xf32> to vector<4x16x16xf32>
    %c0_3 = arith.constant 0 : index
    %c0_4 = arith.constant 0 : index
    %c0_5 = arith.constant 0 : index
    %2 = vector.load %arg3[%c0_3, %c0_4, %c0_5] : memref<1x16x16xi8, #tpu.memory_space<vmem>>, vector<1x16x16xi8>
    %3 = vector.shape_cast %2 : vector<1x16x16xi8> to vector<16x16xi8>
    %4 = arith.extsi %3 : vector<16x16xi8> to vector<16x16xi32>
    %c4_i32 = arith.constant 4 : i32
    %5 = arith.muli %arg1, %c4_i32 : i32
    %6 = tpu.iota {dimensions = array<i32: 0>} : vector<4x1x1xi32>
    %7 = vector.broadcast %5 : i32 to vector<4x1x1xi32>
    %8 = arith.addi %7, %6 : vector<4x1x1xi32>
    %9 = vector.shape_cast %4 : vector<16x16xi32> to vector<1x16x16xi32>
    %10 = vector.broadcast %9 : vector<1x16x16xi32> to vector<4x16x16xi32>
    %11 = vector.broadcast %8 : vector<4x1x1xi32> to vector<4x16x16xi32>
    %12 = arith.cmpi eq, %10, %11 : vector<4x16x16xi32>
    %cst = arith.constant 0.000000e+00 : f32
    %13 = vector.broadcast %cst : f32 to vector<4x16x16xf32>
    %14 = arith.select %12, %1, %13 : vector<4x16x16xi1>, vector<4x16x16xf32>
    %cst_6 = arith.constant dense<0.000000e+00> : vector<4x16xf32>
    %15 = vector.multi_reduction <add>, %1, %cst_6 [1] : vector<4x16x16xf32> to vector<4x16xf32>
    %cst_7 = arith.constant dense<0.000000e+00> : vector<4x16xf32>
    %16 = vector.multi_reduction <add>, %14, %cst_7 [1] : vector<4x16x16xf32> to vector<4x16xf32>
    %c4_i32_8 = arith.constant 4 : i32
    %17 = arith.muli %arg1, %c4_i32_8 : i32
    %c0_9 = arith.constant 0 : index
    %18 = arith.index_cast %17 : i32 to index
    %c0_10 = arith.constant 0 : index
    %19 = vector.load %arg4[%c0_9, %18, %c0_10] : memref<1x4x16xf32, #tpu.memory_space<vmem>>, vector<1x4x16xf32>
    %20 = vector.shape_cast %19 : vector<1x4x16xf32> to vector<4x16xf32>
    %cst_11 = arith.constant 1.000000e+00 : f32
    %21 = vector.broadcast %cst_11 : f32 to vector<16x1xf32>
    %22 = vector.shape_cast %1 : vector<4x16x16xf32> to vector<64x16xf32>
    %cst_12 = arith.constant dense<0.000000e+00> : vector<64x1xf32>
    %23 = tpu.matmul %22, %21, %cst_12 {dimension_numbers = #tpu.dot_dimension_numbers<[1], [0], [0], [1], [0, 0, 1, 1], [], []>} : vector<64x16xf32>, vector<16x1xf32>, vector<64x1xf32> -> vector<64x1xf32>
    %24 = vector.shape_cast %14 : vector<4x16x16xf32> to vector<64x16xf32>
    %cst_13 = arith.constant dense<0.000000e+00> : vector<64x1xf32>
    %25 = tpu.matmul %24, %21, %cst_13 {dimension_numbers = #tpu.dot_dimension_numbers<[1], [0], [0], [1], [0, 0, 1, 1], [], []>} : vector<64x16xf32>, vector<16x1xf32>, vector<64x1xf32> -> vector<64x1xf32>
    %26 = vector.extract_strided_slice %23 {offsets = [0, 0], sizes = [16, 1], strides = [1, 1]} : vector<64x1xf32> to vector<16x1xf32>
    %27 = vector.extract_strided_slice %23 {offsets = [16, 0], sizes = [16, 1], strides = [1, 1]} : vector<64x1xf32> to vector<16x1xf32>
    %28 = vector.extract_strided_slice %23 {offsets = [32, 0], sizes = [16, 1], strides = [1, 1]} : vector<64x1xf32> to vector<16x1xf32>
    %29 = vector.extract_strided_slice %23 {offsets = [48, 0], sizes = [16, 1], strides = [1, 1]} : vector<64x1xf32> to vector<16x1xf32>
    %30 = tpu.concatenate %26, %27, %28, %29 in 1 : vector<16x1xf32>, vector<16x1xf32>, vector<16x1xf32>, vector<16x1xf32> -> vector<16x4xf32>
    %31 = vector.extract_strided_slice %25 {offsets = [0, 0], sizes = [16, 1], strides = [1, 1]} : vector<64x1xf32> to vector<16x1xf32>
    %32 = vector.extract_strided_slice %25 {offsets = [16, 0], sizes = [16, 1], strides = [1, 1]} : vector<64x1xf32> to vector<16x1xf32>
    %33 = vector.extract_strided_slice %25 {offsets = [32, 0], sizes = [16, 1], strides = [1, 1]} : vector<64x1xf32> to vector<16x1xf32>
    %34 = vector.extract_strided_slice %25 {offsets = [48, 0], sizes = [16, 1], strides = [1, 1]} : vector<64x1xf32> to vector<16x1xf32>
    %35 = tpu.concatenate %31, %32, %33, %34 in 1 : vector<16x1xf32>, vector<16x1xf32>, vector<16x1xf32>, vector<16x1xf32> -> vector<16x4xf32>
    %c4_i32_14 = arith.constant 4 : i32
    %36 = arith.muli %arg1, %c4_i32_14 : i32
    %c0_15 = arith.constant 0 : index
    %37 = arith.index_cast %36 : i32 to index
    %c0_16 = arith.constant 0 : index
    %38 = vector.load %arg5[%c0_15, %37, %c0_16] : memref<1x4x16xf32, #tpu.memory_space<vmem>>, vector<1x4x16xf32>
    %39 = vector.shape_cast %38 : vector<1x4x16xf32> to vector<4x16xf32>
    %40 = tpu.transpose %39, [1, 0] : vector<4x16xf32> -> vector<16x4xf32>
    %cst_17 = arith.constant 1.600000e+01 : f32
    %41 = vector.broadcast %cst_17 : f32 to vector<4x16xf32>
    %42 = arith.subf %41, %15 : vector<4x16xf32>
    %43 = arith.subf %42, %20 : vector<4x16xf32>
    %44 = arith.addf %43, %16 : vector<4x16xf32>
    %cst_18 = arith.constant 1.600000e+01 : f32
    %45 = vector.broadcast %cst_18 : f32 to vector<4x16xf32>
    %46 = arith.subf %45, %20 : vector<4x16xf32>
    %cst_19 = arith.constant 1.600000e+01 : f32
    %47 = vector.broadcast %cst_19 : f32 to vector<16x4xf32>
    %48 = arith.subf %47, %30 : vector<16x4xf32>
    %49 = arith.subf %48, %40 : vector<16x4xf32>
    %50 = arith.addf %49, %35 : vector<16x4xf32>
    %cst_20 = arith.constant 1.600000e+01 : f32
    %51 = vector.broadcast %cst_20 : f32 to vector<16x4xf32>
    %52 = arith.subf %51, %40 : vector<16x4xf32>
    %53 = tpu.concatenate %16, %20, %44, %46 in 0 : vector<4x16xf32>, vector<4x16xf32>, vector<4x16xf32>, vector<4x16xf32> -> vector<16x16xf32>
    %cst_21 = arith.constant 6.250000e-02 : f32
    %54 = vector.broadcast %cst_21 : f32 to vector<16x16xf32>
    %55 = arith.mulf %53, %54 : vector<16x16xf32>
    %56 = tpu.concatenate %35, %40, %50, %52 in 1 : vector<16x4xf32>, vector<16x4xf32>, vector<16x4xf32>, vector<16x4xf32> -> vector<16x16xf32>
    %cst_22 = arith.constant 6.250000e-02 : f32
    %57 = vector.broadcast %cst_22 : f32 to vector<16x16xf32>
    %58 = arith.mulf %56, %57 : vector<16x16xf32>
    %c0_23 = arith.constant 0 : index
    %c0_24 = arith.constant 0 : index
    %59 = vector.load %arg6[%c0_23, %c0_24] : memref<16x16xf32, #tpu.memory_space<vmem>>, vector<16x16xf32>
    %cst_25 = arith.constant dense<0.000000e+00> : vector<16x16xf32>
    %60 = tpu.matmul %55, %59, %cst_25 {dimension_numbers = #tpu.dot_dimension_numbers<[1], [0], [0], [1], [0, 0, 1, 1], [], []>} : vector<16x16xf32>, vector<16x16xf32>, vector<16x16xf32> -> vector<16x16xf32>
    %c0_26 = arith.constant 0 : index
    %c0_27 = arith.constant 0 : index
    %61 = vector.load %arg7[%c0_26, %c0_27] : memref<16x16xf32, #tpu.memory_space<vmem>>, vector<16x16xf32>
    %cst_28 = arith.constant dense<0.000000e+00> : vector<16x16xf32>
    %62 = tpu.matmul %61, %58, %cst_28 {dimension_numbers = #tpu.dot_dimension_numbers<[1], [0], [0], [1], [0, 0, 1, 1], [], []>} : vector<16x16xf32>, vector<16x16xf32>, vector<16x16xf32> -> vector<16x16xf32>
    %63 = vector.extract_strided_slice %60 {offsets = [0, 15], sizes = [16, 1], strides = [1, 1]} : vector<16x16xf32> to vector<16x1xf32>
    %cst_29 = arith.constant 5.000000e-01 : f32
    %64 = vector.broadcast %cst_29 : f32 to vector<16x1xf32>
    %65 = arith.addf %63, %64 : vector<16x1xf32>
    %66 = vector.extract_strided_slice %62 {offsets = [15, 0], sizes = [1, 16], strides = [1, 1]} : vector<16x16xf32> to vector<1x16xf32>
    %cst_30 = arith.constant 5.000000e-01 : f32
    %67 = vector.broadcast %cst_30 : f32 to vector<1x16xf32>
    %68 = arith.addf %66, %67 : vector<1x16xf32>
    %cst_31 = arith.constant 1.000000e+00 : f32
    %69 = vector.broadcast %cst_31 : f32 to vector<16x1xf32>
    %70 = arith.divf %69, %65 : vector<16x1xf32>
    %71 = vector.broadcast %70 : vector<16x1xf32> to vector<16x16xf32>
    %72 = arith.mulf %60, %71 : vector<16x16xf32>
    %cst_32 = arith.constant 1.000000e+00 : f32
    %73 = vector.broadcast %cst_32 : f32 to vector<1x16xf32>
    %74 = arith.divf %73, %68 : vector<1x16xf32>
    %75 = vector.broadcast %74 : vector<1x16xf32> to vector<16x16xf32>
    %76 = arith.mulf %62, %75 : vector<16x16xf32>
    %77 = vector.extract_strided_slice %72 {offsets = [0, 0], sizes = [4, 16], strides = [1, 1]} : vector<16x16xf32> to vector<4x16xf32>
    %78 = vector.extract_strided_slice %72 {offsets = [4, 0], sizes = [4, 16], strides = [1, 1]} : vector<16x16xf32> to vector<4x16xf32>
    %79 = arith.subf %77, %78 : vector<4x16xf32>
    %80 = math.absf %79 : vector<4x16xf32>
    %81 = vector.shape_cast %80 : vector<4x16xf32> to vector<1x4x16xf32>
    %cst_33 = arith.constant dense<0.000000e+00> : vector<1xf32>
    %82 = vector.multi_reduction <add>, %81, %cst_33 [1, 2] : vector<1x4x16xf32> to vector<1xf32>
    %83 = vector.shape_cast %82 : vector<1xf32> to vector<1x1x1xf32>
    %84 = vector.extract %83[0, 0, 0] : f32 from vector<1x1x1xf32>
    %85 = vector.extract_strided_slice %72 {offsets = [8, 0], sizes = [4, 16], strides = [1, 1]} : vector<16x16xf32> to vector<4x16xf32>
    %86 = vector.extract_strided_slice %72 {offsets = [12, 0], sizes = [4, 16], strides = [1, 1]} : vector<16x16xf32> to vector<4x16xf32>
    %87 = arith.subf %85, %86 : vector<4x16xf32>
    %88 = math.absf %87 : vector<4x16xf32>
    %89 = vector.shape_cast %88 : vector<4x16xf32> to vector<1x4x16xf32>
    %cst_34 = arith.constant dense<0.000000e+00> : vector<1xf32>
    %90 = vector.multi_reduction <add>, %89, %cst_34 [1, 2] : vector<1x4x16xf32> to vector<1xf32>
    %91 = vector.shape_cast %90 : vector<1xf32> to vector<1x1x1xf32>
    %92 = vector.extract %91[0, 0, 0] : f32 from vector<1x1x1xf32>
    %93 = vector.extract_strided_slice %76 {offsets = [0, 0], sizes = [16, 4], strides = [1, 1]} : vector<16x16xf32> to vector<16x4xf32>
    %94 = vector.extract_strided_slice %76 {offsets = [0, 4], sizes = [16, 4], strides = [1, 1]} : vector<16x16xf32> to vector<16x4xf32>
    %95 = arith.subf %93, %94 : vector<16x4xf32>
    %96 = math.absf %95 : vector<16x4xf32>
    %97 = vector.shape_cast %96 : vector<16x4xf32> to vector<1x16x4xf32>
    %cst_35 = arith.constant dense<0.000000e+00> : vector<1xf32>
    %98 = vector.multi_reduction <add>, %97, %cst_35 [1, 2] : vector<1x16x4xf32> to vector<1xf32>
    %99 = vector.shape_cast %98 : vector<1xf32> to vector<1x1x1xf32>
    %100 = vector.extract %99[0, 0, 0] : f32 from vector<1x1x1xf32>
    %101 = vector.extract_strided_slice %76 {offsets = [0, 8], sizes = [16, 4], strides = [1, 1]} : vector<16x16xf32> to vector<16x4xf32>
    %102 = vector.extract_strided_slice %76 {offsets = [0, 12], sizes = [16, 4], strides = [1, 1]} : vector<16x16xf32> to vector<16x4xf32>
    %103 = arith.subf %101, %102 : vector<16x4xf32>
    %104 = math.absf %103 : vector<16x4xf32>
    %105 = vector.shape_cast %104 : vector<16x4xf32> to vector<1x16x4xf32>
    %cst_36 = arith.constant dense<0.000000e+00> : vector<1xf32>
    %106 = vector.multi_reduction <add>, %105, %cst_36 [1, 2] : vector<1x16x4xf32> to vector<1xf32>
    %107 = vector.shape_cast %106 : vector<1xf32> to vector<1x1x1xf32>
    %108 = vector.extract %107[0, 0, 0] : f32 from vector<1x1x1xf32>
    %109 = vector.extract_strided_slice %65 {offsets = [8, 0], sizes = [4, 1], strides = [1, 1]} : vector<16x1xf32> to vector<4x1xf32>
    %110 = vector.extract_strided_slice %65 {offsets = [12, 0], sizes = [4, 1], strides = [1, 1]} : vector<16x1xf32> to vector<4x1xf32>
    %111 = arith.subf %109, %110 : vector<4x1xf32>
    %112 = math.absf %111 : vector<4x1xf32>
    %113 = vector.shape_cast %112 : vector<4x1xf32> to vector<1x4x1xf32>
    %cst_37 = arith.constant dense<0.000000e+00> : vector<1xf32>
    %114 = vector.multi_reduction <add>, %113, %cst_37 [1, 2] : vector<1x4x1xf32> to vector<1xf32>
    %115 = vector.shape_cast %114 : vector<1xf32> to vector<1x1x1xf32>
    %116 = vector.extract %115[0, 0, 0] : f32 from vector<1x1x1xf32>
    %117 = tpu.iota {dimensions = array<i32: 0>} : vector<8x128xi32>
    %c0_i32 = arith.constant 0 : i32
    %118 = vector.broadcast %c0_i32 : i32 to vector<8x128xi32>
    %119 = arith.cmpi eq, %117, %118 : vector<8x128xi32>
    %cst_38 = arith.constant 0.000000e+00 : f32
    %120 = vector.broadcast %84 : f32 to vector<8x128xf32>
    %121 = vector.broadcast %cst_38 : f32 to vector<8x128xf32>
    %122 = arith.select %119, %120, %121 : vector<8x128xi1>, vector<8x128xf32>
    %c1_i32 = arith.constant 1 : i32
    %123 = vector.broadcast %c1_i32 : i32 to vector<8x128xi32>
    %124 = arith.cmpi eq, %117, %123 : vector<8x128xi32>
    %125 = vector.broadcast %100 : f32 to vector<8x128xf32>
    %126 = arith.select %124, %125, %122 : vector<8x128xi1>, vector<8x128xf32>
    %c2_i32 = arith.constant 2 : i32
    %127 = vector.broadcast %c2_i32 : i32 to vector<8x128xi32>
    %128 = arith.cmpi eq, %117, %127 : vector<8x128xi32>
    %129 = vector.broadcast %92 : f32 to vector<8x128xf32>
    %130 = arith.select %128, %129, %126 : vector<8x128xi1>, vector<8x128xf32>
    %c3_i32 = arith.constant 3 : i32
    %131 = vector.broadcast %c3_i32 : i32 to vector<8x128xi32>
    %132 = arith.cmpi eq, %117, %131 : vector<8x128xi32>
    %133 = vector.broadcast %108 : f32 to vector<8x128xf32>
    %134 = arith.select %132, %133, %130 : vector<8x128xi1>, vector<8x128xf32>
    %c4_i32_39 = arith.constant 4 : i32
    %135 = vector.broadcast %c4_i32_39 : i32 to vector<8x128xi32>
    %136 = arith.cmpi eq, %117, %135 : vector<8x128xi32>
    %137 = vector.broadcast %116 : f32 to vector<8x128xf32>
    %138 = arith.select %136, %137, %134 : vector<8x128xi1>, vector<8x128xf32>
    %c0_40 = arith.constant 0 : index
    %c0_41 = arith.constant 0 : index
    %c0_42 = arith.constant 0 : index
    %c0_43 = arith.constant 0 : index
    %139 = vector.load %arg8[%c0_40, %c0_41, %c0_42, %c0_43] : memref<1x1x8x128xf32, #tpu.memory_space<vmem>>, vector<1x1x8x128xf32>
    %140 = vector.shape_cast %139 : vector<1x1x8x128xf32> to vector<8x128xf32>
    %141 = vector.shape_cast %138 : vector<8x128xf32> to vector<1x1x8x128xf32>
    tpu.vector_store %arg8[%c0_40, %c0_41, %c0_42, %c0_43], %141 {strides = array<i32>} : memref<1x1x8x128xf32, #tpu.memory_space<vmem>>, vector<1x1x8x128xf32>,
    return
  }
  func.func @transform_0(%arg0: i32, %arg1: i32) -> (i32, i32, i32, i32) {
    %c0_i32 = arith.constant 0 : i32
    %c0_i32_0 = arith.constant 0 : i32
    %c0_i32_1 = arith.constant 0 : i32
    return %arg0, %arg1, %c0_i32, %c0_i32_0 : i32, i32, i32, i32
  }
  func.func @transform_1(%arg0: i32, %arg1: i32) -> (i32, i32, i32) {
    %c0_i32 = arith.constant 0 : i32
    %c0_i32_0 = arith.constant 0 : i32
    %c0_i32_1 = arith.constant 0 : i32
    return %arg0, %c0_i32, %c0_i32_0 : i32, i32, i32
  }
  func.func @transform_2(%arg0: i32, %arg1: i32) -> (i32, i32, i32) {
    %c0_i32 = arith.constant 0 : i32
    %c0_i32_0 = arith.constant 0 : i32
    %c0_i32_1 = arith.constant 0 : i32
    return %arg0, %c0_i32, %c0_i32_0 : i32, i32, i32
  }
  func.func @transform_3(%arg0: i32, %arg1: i32) -> (i32, i32, i32) {
    %c0_i32 = arith.constant 0 : i32
    %c0_i32_0 = arith.constant 0 : i32
    %c0_i32_1 = arith.constant 0 : i32
    return %arg0, %c0_i32, %c0_i32_0 : i32, i32, i32
  }
  func.func @transform_4(%arg0: i32, %arg1: i32) -> (i32, i32) {
    %c0_i32 = arith.constant 0 : i32
    %c0_i32_0 = arith.constant 0 : i32
    %c0_i32_1 = arith.constant 0 : i32
    return %c0_i32, %c0_i32_0 : i32, i32
  }
  func.func @transform_5(%arg0: i32, %arg1: i32) -> (i32, i32) {
    %c0_i32 = arith.constant 0 : i32
    %c0_i32_0 = arith.constant 0 : i32
    %c0_i32_1 = arith.constant 0 : i32
    return %c0_i32, %c0_i32_0 : i32, i32
  }
  func.func @transform_6(%arg0: i32, %arg1: i32) -> (i32, i32, i32, i32) {
    %c0_i32 = arith.constant 0 : i32
    %c0_i32_0 = arith.constant 0 : i32
    %c0_i32_1 = arith.constant 0 : i32
    return %arg0, %arg1, %c0_i32, %c0_i32_0 : i32, i32, i32, i32
  }
}

</mosaic_0001>

<bundles_post_ra>
// kernel: tpu_custom_call.1
= control target key start
LH: loop header
LB: loop body
LE: loop exit
PB: predicated region body
PF: predicated region fallthrough
CT: control target
= control target key end

     0   :  { %s2502_s0 = inlined_call_operand.hbm [shape: f32[2,4,16,16], index: 0, kind: input, shape index: {}]   ;;  %s2503_s1 = inlined_call_operand.hbm [shape: s8[2,16,16], index: 1, kind: input, shape index: {}]   ;;  %s2504_s2 = inlined_call_operand.hbm [shape: f32[2,4,16], index: 2, kind: input, shape index: {}]   ;;  %s2505_s3 = inlined_call_operand.hbm [shape: f32[2,4,16], index: 3, kind: input, shape index: {}]   ;;  %s2506_s4 = inlined_call_operand.hbm [shape: f32[16,16], index: 4, kind: input, shape index: {}]   ;;  %s2507_s5 = inlined_call_operand.vmem [shape: f32[16,16], index: 5, kind: input, shape index: {}]   ;;  %s2508_s6 = inlined_call_operand.hbm [shape: f32[2,1,8,128], index: 6, kind: output, shape index: {}]  }
   0x1   :  { %2523 = sst [smem:[#allocation22_spill]] %s2503_s1 }
   0x2   :  { %2524 = sst [smem:[#allocation23_spill]] %s2506_s4 }
   0x3   :  { %2525 = sst [smem:[#allocation24_spill]] %s2508_s6 }
   0x4   :  { %11 = vsyncpa [#allocation3], 0 }
   0x5   :  { %13 = vsyncpa [#allocation3 + $0x1], 0 }
   0x6   :  { %14 = vsyncpa [#allocation6], 0 }
   0x7   :  { %16 = vsyncpa [#allocation6 + $0x1], 0 }
   0x8   :  { %17 = vsyncpa [#allocation9], 0 }
   0x9   :  { %19 = vsyncpa [#allocation9 + $0x1], 0 }
   0xa   :  { %20 = vsyncpa [#allocation4], 0 }
   0xb   :  { %22 = vsyncpa [#allocation4 + $0x1], 0  ;;  %s2016_s21 = smov 0   ;;  %s2018_s22 = smov 0  }
   0xc   :  { %s2020_s23 = smov 0   ;;  %s2022_s24 = smov 0  }
   0xd   :  { %s2024_s25 = smov 0   ;;  %s2026_s26 = smov 0  }
   0xe LB: > { %2526 = sst [smem:[#allocation17_spill]] %s1938_s21  ;;  %s2047_s27 = sadd.s32 4294967295, %s1958_s26   ;;  %s1958_s26 = sphi %s2026_s26, %s28_s26   ;;  %s1954_s25 = sphi %s2024_s25, %s2568_s25   ;;  %s1950_s24 = sphi %s2022_s24, %s2567_s24   ;;  %s1946_s23 = sphi %s2020_s23, %s2566_s23   ;;  %s1942_s22 = sphi %s2018_s22, %s2565_s22   ;;  %s1938_s21 = sphi %s2016_s21, %s2564_s21  }
   0xf   : > { %2527 = sst [smem:[#allocation18_spill]] %s1946_s23  ;;  %s1457_s28 = sadd.s32 4294967294, %s1958_s26  }
  0x10   : > { %p56_p0 = scmp.ne.s32.totalorder %s1946_s23, %s1942_s22  ;;  %p57_p1 = scmp.eq.s32.totalorder %s1958_s26, 0 }
  0x11   : > { %p62_p2 = scmp.ne.s32.totalorder %s1942_s22, %s1938_s21  ;;  %p2509_p3 = scmp.eq.s32.totalorder %s2047_s27, 0 }
  0x12   : > { %p208_p4 = scmp.eq.s32.totalorder %s2047_s27, 1  ;;  %p2058_p5 = por %p57_p1, %p56_p0 }
  0x13   : > { %p214_p6 = scmp.eq.s32.totalorder %s1457_s28, 1  ;;  %p2064_p7 = por %p2509_p3, %p62_p2 }
  0x14   : > { %s2528_s30 = scalar_select %p2058_p5, 1, 0 }
  0x15   : > { %s2529_s7 = scalar_select %p2064_p7, 1, 0 }
  0x16   : > { %p2068_p8 = por %p208_p4, %p56_p0  ;;  %p2072_p9 = por %p214_p6, %p62_p2 }
  0x17   : > { %p1458_p10 = scmp.ge.s32.totalorder %s1958_s26, 1  ;;  %p221_p11 = scmp.lt.s32.totalorder %s1958_s26, 3 }
  0x18   : > { %s2530_s8 = scalar_select %p2068_p8, 1, 0 }
  0x19   : > { %s2531_s9 = scalar_select %p2072_p9, 1, 0 }
  0x1a   : > { %p2078_p12 = pnand %p1458_p10, %p221_p11  ;;  %s1960_s11 = smov [#allocation10]  }
  0x1b   : > { %2532 = sst [smem:[#allocation19_spill]] %s2531_s9  ;;  %s233_s12 = sshll.u32 %s1960_s11, 4  ;;  %s2082_s12 = int_to_ptr.vmem [resolvable:$true] %s233_s12 }
  0x1c   : > { %s2533_s10 = scalar_select %p2078_p12, 1, 0 }
  0x1d   : > { %p1618_p13 = pneg %p2078_p12  ;;  %s40_s14 = sadd.s32 1, %s1954_s25 }
  0x1e   : > { %s2096_s15 = sand.u32 1, %s1946_s23   ;;  %p2098_p4 = scmp.ge.s32.totalorder %s40_s14, 2 }
  0x1f   : > { %p2090_p2 = pnand %p1618_p13, %p2509_p3  ;;  %s2536_s4 = sld [smem:[#allocation23_spill]] }
  0x20   : > { %s2535_s16 = scalar_select %p2098_p4, 1, 0 }
  0x21   : > { %p1718_p10 = pneg %p2090_p2 }
  0x25   : > { %s1716_s19 = scalar_lea.hbm %s2536_s4, 256 }
  0x26   : > { %p1717_p6 = scmp.ne.s32.totalorder %s2536_s4, %s1716_s19  ;;  %p1723_p0 = scmp.lt.u32.totalorder %s1716_s19, %s2536_s4 }
  0x28   : > { %p1719_p11 = pnand %p1718_p10, %p1717_p6 }
  0x2a   : > { %p1720_p13 = pneg %p1719_p11 }
  0x2c   : > { %p1725_p3 = pnand %p1723_p0, %p1720_p13 }
  0x2e   : > { %1728 = shalt.err (!%p1725_p3)
}
  0x2f   : > { %s1729_s9 = scalar_lea.vmem %s2082_s12, 256  ;;  %p1737_p7 = scmp.lt.s32.totalorder %s2082_s12, %s2082_s12 }
  0x30   : > { %p1730_p1 = scmp.ne.s32.totalorder %s2082_s12, %s1729_s9  ;;  %p1738_p12 = scmp.lt.s32.totalorder %s1729_s9, %s1729_s9 }
  0x32   : > { %p1732_p9 = pnand %p1730_p1, %p1718_p10  ;;  %p1739_p5 = por %p1738_p12, %p1737_p7 }
  0x34   : > { %p1733_p8 = pneg %p1732_p9 }
  0x36   : > { %p1740_p4 = pnand %p1739_p5, %p1733_p8 }
  0x38   : > { %1743 = shalt.err (!%p1740_p4)
}
  0x39   : > { %s2514_s17 = smov 128   ;;  %s2515_s29 = smov 8  }
  0x3a   : > { %1621 = dma.hbm_to_vmem [thread:$0]  (!%p2090_p2), %s2536_s4, 256, %s2082_s12, [#allocation9], %s2514_s17, %s2514_s17, %s2515_s29  }
  0x3b   : > { %p2537_p3 = scmp.ne.s32.totalorder %s2535_s16, 0  ;;  %p2539_p5 = scmp.ne.s32.totalorder %s2528_s30, 0 }
  0x3c   : > { %p2540_p7 = scmp.lt.s32.totalorder %s1958_s26, 2  ;;  %s2517_s20 = sand.u32 1, %s1958_s26  }
  0x3d   : > { %s2570_s14 = smov (%p2537_p3, %s40_s14), 0  ;;  %s2142_s28 = sshll.u32 %s2096_s15, 2 }
  0x3e   : > { %2538 = sst [smem:[#allocation20_spill]] %s2570_s14  ;;  %p2134_p8 = pnand %p2540_p7, %p2539_p5 }
  0x3f   : > { %s44_s13 = ssub.s32 %s1954_s25, %s2570_s14  ;;  %s2145_s11 = sshll.u32 %s1954_s25, 6 }
  0x40   : > { %s2541_s19 = scalar_select %p2134_p8, 1, 0 }
  0x41   : > { %p47_p9 = scmp.eq.s32.totalorder %s44_s13, 0  ;;  %s2542_s12 = sadd.s32 1, %s1946_s23 }
  0x42   : > { %s2544_s1 = sld [smem:[#allocation22_spill]]  ;;  %s278_s17 = scalar_lea.vmem [#allocation5], %s2142_s28 }
  0x43   : > { %s2150_s16 = scalar_select %p47_p9, %s1946_s23, %s2542_s12  }
  0x44   : > { %s285_s13 = sshll.u32 %s278_s17, 4  ;;  %s2163_s29 = scalar_lea.sflag [#allocation6], %s2517_s20  ;;  %s2159_s13 = int_to_ptr.vmem [resolvable:$true] %s285_s13 }
  0x45   : > { %2543 = sst [smem:[#allocation21_spill]] %s2150_s16  ;;  %p2169_p0 = pneg %p2134_p8 }
  0x48   : > { %s2156_s18 = scalar_lea.hbm %s2544_s1, %s2145_s11  ;;  %s1749_s17 = scalar_lea.hbm %s2544_s1, 128 }
  0x49   : > { %s1744_s4 = scalar_lea.hbm %s2156_s18, 64  ;;  %p1750_p4 = scmp.lt.u32.totalorder %s2156_s18, %s2544_s1 }
  0x4a   : > { %p1745_p12 = scmp.ne.s32.totalorder %s2156_s18, %s1744_s4  ;;  %p1751_p6 = scmp.lt.u32.totalorder %s1749_s17, %s1744_s4 }
  0x4b   : > { %p1753_p11 = scmp.lt.u32.totalorder %s1744_s4, %s2156_s18 }
  0x4c   : > { %p1747_p1 = pnand %p2169_p0, %p1745_p12  ;;  %p1752_p10 = por %p1751_p6, %p1750_p4 }
  0x4e   : > { %p1748_p2 = pneg %p1747_p1  ;;  %p1754_p13 = por %p1753_p11, %p1752_p10 }
  0x50   : > { %p1755_p3 = pnand %p1754_p13, %p1748_p2 }
  0x52   : > { %1758 = shalt.err (!%p1755_p3)
}
  0x53   : > { %s1759_s20 = scalar_lea.vmem %s2159_s13, 64  ;;  %s1963_s30 = smov [#allocation5]  }
  0x54   : > { %p1760_p5 = scmp.ne.s32.totalorder %s2159_s13, %s1759_s20  ;;  %s1764_s9 = sshll.u32 %s1963_s30, 4  ;;  %s1765_s9 = int_to_ptr.vmem [resolvable:$false] %s1764_s9 }
  0x55   : > { %s1766_s14 = scalar_lea.vmem %s1765_s9, 128  ;;  %p1767_p12 = scmp.lt.s32.totalorder %s2159_s13, %s1765_s9 }
  0x56   : > { %p1762_p7 = pnand %p1760_p5, %p2169_p0  ;;  %p1768_p1 = scmp.lt.s32.totalorder %s1766_s14, %s1759_s20 }
  0x58   : > { %p1763_p9 = pneg %p1762_p7  ;;  %p1769_p4 = por %p1768_p1, %p1767_p12 }
  0x5a   : > { %p1770_p6 = pnand %p1769_p4, %p1763_p9 }
  0x5c   : > { %1773 = shalt.err (!%p1770_p6)
}
  0x5d   : > { %s1964_s4 = smov 32   ;;  %s1965_s16 = smov 2  }
  0x5e   : > { %1628 = dma.hbm_to_vmem [thread:$0]  (!%p2134_p8), %s2156_s18, 64, %s2159_s13, %s2163_s29, %s1964_s4, %s1964_s4, %s1965_s16  }
  0x5f   : > { %s1461_s17 = sshll.u32 %s2096_s15, 6  ;;  %s1502_s30 = sshll.u32 %s1954_s25, 10 }
  0x60   : > { %s2198_s20 = scalar_lea.hbm %s2502_s0, %s1502_s30  ;;  %s254_s14 = scalar_lea.vmem [#allocation2], %s1461_s17 }
  0x61   : > { %s264_s23 = sshll.u32 %s254_s14, 4  ;;  %s251_s21 = scalar_lea.sflag [#allocation3], %s2096_s15  ;;  %s2200_s23 = int_to_ptr.vmem [resolvable:$true] %s264_s23 }
  0x62   : > { %s1774_s6 = scalar_lea.hbm %s2198_s20, 1024  ;;  %s1779_s1 = scalar_lea.hbm %s2502_s0, 2048 }
  0x63   : > { %p1775_p2 = scmp.ne.s32.totalorder %s2198_s20, %s1774_s6  ;;  %p1780_p13 = scmp.lt.u32.totalorder %s2198_s20, %s2502_s0 }
  0x64   : > { %p1781_p3 = scmp.lt.u32.totalorder %s1779_s1, %s1774_s6  ;;  %p1783_p7 = scmp.lt.u32.totalorder %s1774_s6, %s2198_s20 }
  0x65   : > { %p1777_p10 = pnand %p1775_p2, %p2169_p0 }
  0x66   : > { %p1782_p5 = por %p1781_p3, %p1780_p13 }
  0x67   : > { %p1778_p11 = pneg %p1777_p10 }
  0x68   : > { %p1784_p9 = por %p1783_p7, %p1782_p5 }
  0x6a   : > { %p1785_p12 = pnand %p1784_p9, %p1778_p11 }
  0x6c   : > { %1788 = shalt.err (!%p1785_p12)
}
  0x6d   : > { %s1789_s17 = scalar_lea.vmem %s2200_s23, 1024  ;;  %s1966_s30 = smov [#allocation2]  }
  0x6e   : > { %p1790_p1 = scmp.ne.s32.totalorder %s2200_s23, %s1789_s17  ;;  %s1794_s9 = sshll.u32 %s1966_s30, 4  ;;  %s1795_s9 = int_to_ptr.vmem [resolvable:$false] %s1794_s9 }
  0x6f   : > { %s1796_s14 = scalar_lea.vmem %s1795_s9, 2048  ;;  %p1797_p2 = scmp.lt.s32.totalorder %s2200_s23, %s1795_s9 }
  0x70   : > { %p1792_p4 = pnand %p1790_p1, %p2169_p0  ;;  %p1798_p10 = scmp.lt.s32.totalorder %s1796_s14, %s1789_s17 }
  0x72   : > { %p1793_p6 = pneg %p1792_p4  ;;  %p1799_p13 = por %p1798_p10, %p1797_p2 }
  0x74   : > { %p1800_p3 = pnand %p1799_p13, %p1793_p6 }
  0x76   : > { %1803 = shalt.err (!%p1800_p3)
}
  0x77   : > { %s2546_s6 = smov 8   ;;  %s2547_s18 = smov 128  }
  0x78   : > { %1625 = dma.hbm_to_vmem [thread:$0]  (!%p2134_p8), %s2198_s20, 1024, %s2200_s23, %s251_s21, %s2547_s18, %s2547_s18, %s2546_s6  }
  0x79   : > { %s2233_s4 = scalar_lea.hbm %s2504_s2, %s2145_s11  ;;  %s299_s16 = scalar_lea.vmem [#allocation7], %s2142_s28 }
  0x7a   : > { %s306_s17 = sshll.u32 %s299_s16, 4  ;;  %s1804_s30 = scalar_lea.hbm %s2233_s4, 64  ;;  %s307_s17 = int_to_ptr.vmem [resolvable:$true] %s306_s17 }
  0x7b   : > { %p1805_p11 = scmp.ne.s32.totalorder %s2233_s4, %s1804_s30  ;;  %s1809_s21 = scalar_lea.hbm %s2504_s2, 128 }
  0x7c   : > { %p1810_p9 = scmp.lt.u32.totalorder %s2233_s4, %s2504_s2  ;;  %p1811_p12 = scmp.lt.u32.totalorder %s1809_s21, %s1804_s30 }
  0x7d   : > { %p1807_p5 = pnand %p1805_p11, %p2169_p0  ;;  %p1813_p4 = scmp.lt.u32.totalorder %s1804_s30, %s2233_s4 }
  0x7e   : > { %p1812_p1 = por %p1811_p12, %p1810_p9 }
  0x7f   : > { %p1808_p7 = pneg %p1807_p5 }
  0x80   : > { %p1814_p6 = por %p1813_p4, %p1812_p1 }
  0x82   : > { %p1815_p2 = pnand %p1814_p6, %p1808_p7 }
  0x84   : > { %1818 = shalt.err (!%p1815_p2)
}
  0x85   : > { %s1819_s14 = scalar_lea.vmem %s307_s17, 64  ;;  %s1967_s6 = smov [#allocation7]  }
  0x86   : > { %p1820_p10 = scmp.ne.s32.totalorder %s307_s17, %s1819_s14  ;;  %s1824_s18 = sshll.u32 %s1967_s6, 4  ;;  %s1825_s18 = int_to_ptr.vmem [resolvable:$false] %s1824_s18 }
  0x87   : > { %s1826_s13 = scalar_lea.vmem %s1825_s18, 128  ;;  %p1827_p11 = scmp.lt.s32.totalorder %s307_s17, %s1825_s18 }
  0x88   : > { %p1822_p13 = pnand %p1820_p10, %p2169_p0  ;;  %p1828_p5 = scmp.lt.s32.totalorder %s1826_s13, %s1819_s14 }
  0x8a   : > { %p1823_p3 = pneg %p1822_p13  ;;  %p1829_p8 = por %p1828_p5, %p1827_p11 }
  0x8c   : > { %p1830_p9 = pnand %p1829_p8, %p1823_p3 }
  0x8e   : > { %1833 = shalt.err (!%p1830_p9)
}
  0x8f   : > { %p2548_p12 = scmp.ne.s32.totalorder %s2541_s19, 0  ;;  %s2258_s30 = scalar_lea.hbm %s2505_s3, %s2145_s11 }
  0x90   : > { %s317_s15 = scalar_lea.vmem [#allocation8], %s2142_s28  ;;  %s2549_s21 = sand.u32 1, %s1958_s26  }
  0x91   : > { %1631 = dma.hbm_to_vmem [thread:$0]  (!%p2548_p12), %s2233_s4, 64, %s307_s17, %s2163_s29  }
  0x92   : > { %s324_s9 = sshll.u32 %s317_s15, 4  ;;  %s314_s23 = scalar_lea.sflag [#allocation9], %s2549_s21  ;;  %s325_s9 = int_to_ptr.vmem [resolvable:$true] %s324_s9 }
  0x93   : > { %s1834_s20 = scalar_lea.hbm %s2258_s30, 64  ;;  %s1839_s17 = scalar_lea.hbm %s2505_s3, 128 }
  0x94   : > { %p1835_p8 = scmp.ne.s32.totalorder %s2258_s30, %s1834_s20  ;;  %p1840_p4 = scmp.lt.u32.totalorder %s2258_s30, %s2505_s3 }
  0x95   : > { %p1841_p6 = scmp.lt.u32.totalorder %s1839_s17, %s1834_s20  ;;  %p1843_p10 = scmp.lt.u32.totalorder %s1834_s20, %s2258_s30 }
  0x96   : > { %p1837_p7 = pnand %p1835_p8, %p2169_p0 }
  0x97   : > { %p1842_p2 = por %p1841_p6, %p1840_p4 }
  0x98   : > { %p1838_p1 = pneg %p1837_p7 }
  0x99   : > { %p1844_p13 = por %p1843_p10, %p1842_p2 }
  0x9b   : > { %p1845_p3 = pnand %p1844_p13, %p1838_p1 }
  0x9d   : > { %1848 = shalt.err (!%p1845_p3)
}
  0x9e   : > { %s1849_s28 = scalar_lea.vmem %s325_s9, 64  ;;  %s1968_s6 = smov [#allocation8]  }
  0x9f   : > { %p1850_p11 = scmp.ne.s32.totalorder %s325_s9, %s1849_s28  ;;  %s1854_s18 = sshll.u32 %s1968_s6, 4  ;;  %s1855_s18 = int_to_ptr.vmem [resolvable:$false] %s1854_s18 }
  0xa0   : > { %s1856_s13 = scalar_lea.vmem %s1855_s18, 128  ;;  %p1857_p8 = scmp.lt.s32.totalorder %s325_s9, %s1855_s18 }
  0xa1   : > { %p1852_p5 = pnand %p1850_p11, %p2169_p0  ;;  %p1858_p7 = scmp.lt.s32.totalorder %s1856_s13, %s1849_s28 }
  0xa3   : > { %p1853_p9 = pneg %p1852_p5  ;;  %p1859_p12 = por %p1858_p7, %p1857_p8 }
  0xa5   : > { %p1860_p4 = pnand %p1859_p12, %p1853_p9 }
  0xa7   : > { %1863 = shalt.err (!%p1860_p4)
}
  0xa8   : > { %p2550_p6 = scmp.ne.s32.totalorder %s2541_s19, 0  ;;  %p2551_p1 = scmp.ne.s32.totalorder %s2533_s10, 0 }
  0xa9   : > { %s2283_s12 = sand.u32 (!%p2551_p1), 1, %s1942_s22   ;;  %p2552_p0 = scmp.ne.s32.totalorder (!%p2551_p1), %s2529_s7, 0 }
  0xaa   : > { %1634 = dma.hbm_to_vmem [thread:$0]  (!%p2550_p6), %s2258_s30, 64, %s325_s9, %s314_s23  }
  0xab   : > { %333 = sbr.rel (%p2551_p1) target bundleno = 1426 (0x592), region = 44  ;;  %s1472_s1 = sshll.u32 (!%p2551_p1), %s2283_s12, 6 }
  0xac   : > { %s336_s16 = scalar_lea.sflag (!%p2551_p1), [#allocation3], %s2283_s12  ;;  %s2287_s15 = scalar_lea.vmem (!%p2551_p1), [#allocation2], %s1472_s1 }
  0xb2   : > { %1917 = dma.done.wait (%p2552_p0), %s336_s16, 1024  }
  0xb3   : > { %1919 = vsyncadd (%p2552_p0), %s336_s16, 4294966272  ;;  %s344_s10 = sand.u32 1, %s2047_s27   ;;  %s2295_s19 = sshll.u32 %s2283_s12, 2 }
  0xb4   : > { %s345_s30 = scalar_lea.sflag [#allocation6], %s344_s10  ;;  %s348_s9 = scalar_lea.vmem [#allocation5], %s2295_s19 }
  0xb5   : > { %1921 = dma.done.wait (%p2552_p0), %s345_s30, 128  }
  0xb6   : > { %1923 = vsyncadd (%p2552_p0), %s345_s30, 4294967168  ;;  %s357_s21 = scalar_lea.vmem [#allocation7], %s2295_s19  ;;  %s363_s23 = scalar_lea.sflag [#allocation9], %s344_s10 }
  0xb7   : > { %s366_s20 = scalar_lea.vmem [#allocation8], %s2295_s19 }
  0xb8   : > { %1925 = dma.done.wait (%p2552_p0), %s363_s23, 64  }
  0xb9   : > { %1927 = vsyncadd (%p2552_p0), %s363_s23, 4294967232  ;;  %p2553_p12 = scmp.eq.s32.totalorder %s2047_s27, 0 }
  0xbb   : > { %1929 = dma.done.wait (%p2553_p12), [#allocation9], 256   ;;  %p2554_p2 = pmov %p2553_p12 }
  0xbc   : > { %v1969_v0 = vmov 1.0|1.0   ;;  %vm448_vm0 = vcmask 130048   ;;  %v415_v1 = vld [vmem:[%s2287_s15] sm:$0xff]  ;;  %v416_v2 = vld [vmem:[%s2287_s15 + $0x8] sm:$0xff]  ;;  %v417_v3 = vld [vmem:[%s2287_s15 + $0x10] sm:$0xff] }
  0xbd   : > { %1931 = vsyncadd (%p2554_p2), [#allocation9], 4294967040  ;;  %1582 = vmatprep.subr.bf16.mxu0 %v1969_v0  ;;  %1584 = vmatprep.subr.bf16.mxu1 %v1969_v0  ;;  %v449_v4 = vsel %vm448_vm0, %v415_v1, 0.0  ;;  %v450_v5 = vsel %vm448_vm0, %v416_v2, 0.0  ;;  %v458_v6 = vsel %vm448_vm0, %v417_v3, 0.0  ;;  %v418_v7 = vld [vmem:[%s2287_s15 + $0x18] sm:$0xff] }
  0xbe   : > { %1583 = vmatpush3.bf16.msra.mxu0 %v1969_v0  ;;  %1585 = vmatpush3.bf16.msra.mxu1 %v1969_v0  ;;  %v451_v8 = vadd.f32 %v450_v5, %v449_v4  ;;  %v459_v9 = vsel %vm448_vm0, %v418_v7, 0.0  ;;  %v1505_v10 = vld [vmem:[%s348_s9] sm:$0xf]   ;;  %v2330_v16 = vld [vmem:[%s2287_s15 + $0x28] sm:$0xff]  ;;  %v2333_v17 = vld [vmem:[%s2287_s15 + $0x30] sm:$0xff]  ;;  %vm911_vm9 = vcmask 1041409  }
  0xbf   : > { %1540 = vmatprep.mubr.msk.f32.mxu0 %vm448_vm0, %v415_v1  ;;  %v419_v11 = vld [vmem:[%s2287_s15 + $0x20] sm:$0xff]  ;;  %v460_v12 = vadd.f32 %v459_v9, %v458_v6  ;;  %v2324_v13 = vunpack.c.0.s8 %v1505_v10  ;;  %v2326_v14 = vunpack.c.1.s8 %v1505_v10  ;;  %v468_v19 = vsel %vm448_vm0, %v2330_v16, 0.0  ;;  %v422_v37 = vld [vmem:[%s2287_s15 + $0x38] sm:$0xff]  ;;  %v2360_v47 = vld [vmem:[%s357_s21] sm:$0xf]  ;;  %s1970_s27 = smov 1  }
  0xc0   : > { %v467_v15 = vsel %vm448_vm0, %v419_v11, 0.0  ;;  %v452_v18 = vrot.slane %v451_v8, 4  ;;  %v476_v20 = vsel %vm448_vm0, %v2333_v17, 0.0  ;;  %v477_v41 = vsel %vm448_vm0, %v422_v37, 0.0  ;;  %s1971_s7 = smov 2   ;;  %s1972_s29 = smov 3  }
  0xc1   : > { %1541 = vmatmul.mubr.msk.f32.vlgmr.msra.gmra.mrb[0].mxu0 %vm448_vm0, %v416_v2  ;;  %v461_v21 = vrot.slane %v460_v12, 4  ;;  %vm432_vm1 = vcmp.eq.s32.totalorder %v2324_v13, 0  ;;  %vm433_vm2 = vcmp.eq.s32.totalorder %v2326_v14, 0  ;;  %v469_v22 = vadd.f32 %v468_v19, %v467_v15  ;;  %s1973_s4 = smov 4   ;;  %s1974_s17 = smov 12  }
  0xc2   : > { %1543 = vmatprep.mubr.msk.f32.mxu0 %vm448_vm0, %v417_v3  ;;  %v453_v23 = vadd.f32 %v452_v18, %v451_v8  ;;  %v440_v24 = vsel %vm432_vm1, %v415_v1, 0.0  ;;  %v441_v25 = vsel %vm433_vm2, %v416_v2, 0.0  ;;  %vm434_vm3 = vcmp.eq.s32.totalorder %v2324_v13, 1  ;;  %s1975_s11 = smov 8   ;;  %s1977_s13 = smov 124  }
  0xc3   : > { %v462_v26 = vadd.f32 %v461_v21, %v460_v12  ;;  %v485_v27 = vsel %vm448_vm0, %v440_v24, 0.0  ;;  %v486_v28 = vsel %vm448_vm0, %v441_v25, 0.0  ;;  %1556 = vmatprep.mubr.msk.f32.mxu1 %vm448_vm0, %v440_v24  ;;  %v470_v29 = vrot.slane %v469_v22, 4  ;;  %s1978_s1 = smov 120   ;;  %s1979_s16 = smov 113  }
  0xc4   : > { %v454_v30 = vrot.slane %v453_v23, 2  ;;  %v487_v31 = vadd.f32 %v486_v28, %v485_v27  ;;  %1557 = vmatmul.mubr.msk.f32.vlgmr.msra.gmra.mrb[0].mxu1 %vm448_vm0, %v441_v25  ;;  %v442_v32 = vsel %vm434_vm3, %v417_v3, 0.0  ;;  %vm435_vm4 = vcmp.eq.s32.totalorder %v2326_v14, 1  ;;  %s1477_s30 = sshll.u32 %s2283_s12, 3  ;;  %s1499_s21 = sshll.u32 %s1950_s24, 7 }
  0xc5   : > { %1544 = vmatmul.mubr.msk.f32.gmra.mrb[2].mxu0 %vm448_vm0, %v418_v7  ;;  %v463_v33 = vrot.slane %v462_v26, 2  ;;  %v471_v34 = vadd.f32 %v470_v29, %v469_v22  ;;  %v494_v35 = vsel %vm448_vm0, %v442_v32, 0.0  ;;  %1559 = vmatprep.mubr.msk.f32.mxu1 %vm448_vm0, %v442_v32  ;;  %v443_v36 = vsel %vm435_vm4, %v418_v7, 0.0  ;;  %s413_s23 = scalar_lea.vmem [#allocation11], %s1477_s30  ;;  %s1281_s24 = scalar_lea.sflag [#allocation4], %s2283_s12 }
  0xc6   : > { %1546 = vmatprep.mubr.msk.f32.mxu0 %vm448_vm0, %v419_v11  ;;  %v455_v38 = vadd.f32 %v454_v30, %v453_v23  ;;  %v488_v39 = vrot.slane %v487_v31, 4  ;;  %v495_v40 = vsel %vm448_vm0, %v443_v36, 0.0  ;;  %v478_v45 = vadd.f32 %v477_v41, %v476_v20  ;;  %p2556_p13 = scmp.ne.s32.totalorder %s2530_s8, 0  ;;  %s1980_s14 = smov [#allocation11]  }
  0xc7   : > { %v464_v42 = vadd.f32 %v463_v33, %v462_v26  ;;  %v472_v43 = vrot.slane %v471_v34, 2  ;;  %v496_v44 = vadd.f32 %v495_v40, %v494_v35  ;;  %vm436_vm5 = vcmp.eq.s32.totalorder %v2324_v13, 2  ;;  %s1868_s28 = sshll.u32 %s1980_s14, 4  ;;  %s1869_s28 = int_to_ptr.vmem [resolvable:$false] %s1868_s28 }
  0xc8   : > { %v456_v46 = vrot.slane %v455_v38, 1  ;;  %v489_v48 = vadd.f32 %v488_v39, %v487_v31  ;;  %1560 = vmatmul.mubr.msk.f32.gmra.mrb[2].mxu1 %vm448_vm0, %v443_v36  ;;  %v479_v52 = vrot.slane %v478_v45, 4  ;;  %v444_v55 = vsel %vm436_vm5, %v419_v11, 0.0  ;;  %s1870_s6 = scalar_lea.vmem %s1869_s28, 256 }
  0xc9   : > { %1547 = vmatmul.mubr.msk.f32.gmra.mrb[4].mxu0 %vm448_vm0, %v2330_v16  ;;  %v465_v49 = vrot.slane %v464_v42, 1  ;;  %v473_v50 = vadd.f32 %v472_v43, %v471_v34  ;;  %v497_v51 = vrot.slane %v496_v44, 4  ;;  %vm437_vm6 = vcmp.eq.s32.totalorder %v2326_v14, 2  ;;  %1562 = vmatprep.mubr.msk.f32.mxu1 %vm448_vm0, %v444_v55 }
  0xca   : > { %1549 = vmatprep.mubr.msk.f32.mxu0 %vm448_vm0, %v2333_v17  ;;  %v457_v53 = vadd.f32 %v456_v46, %v455_v38  ;;  %v490_v54 = vrot.slane %v489_v48, 2  ;;  %v883_v57 = vrot.slane %v2360_v47, 1  ;;  %v480_v59 = vadd.f32 %v479_v52, %v478_v45 }
  0xcb   : > { %v466_v56 = vadd.f32 %v465_v49, %v464_v42  ;;  %v498_v58 = vadd.f32 %v497_v51, %v496_v44  ;;  %v474_v62 = vrot.slane %v473_v50, 1  ;;  %v445_v63 = vsel %vm437_vm6, %v2330_v16, 0.0 }
  0xcc   : > { %v878_v60 = vsub.f32 16.0, %v457_v53  ;;  %v491_v61 = vadd.f32 %v490_v54, %v489_v48  ;;  %v481_v2 = vrot.slane %v480_v59, 2  ;;  %v503_v3 = vsel %vm448_vm0, %v444_v55, 0.0  ;;  %1563 = vmatmul.mubr.msk.f32.gmra.mrb[4].mxu1 %vm448_vm0, %v445_v63 }
  0xcd   : > { %1550 = vmatmul.mubr.msk.f32.gmra.mrb[6].mxu0 %vm448_vm0, %v422_v37  ;;  %v879_v0 = vsub.f32 16.0, %v466_v56  ;;  %v499_v1 = vrot.slane %v498_v58, 2  ;;  %v504_v6 = vsel %vm448_vm0, %v445_v63, 0.0  ;;  %vm438_vm7 = vcmp.eq.s32.totalorder %v2324_v13, 3  ;;  %v845_v63 = vld [vmem:[%s366_s20] sm:$0xf] }
  0xce   : > { %v492_v4 = vrot.slane %v491_v61, 1  ;;  %v890_v5 = vsub.f32 %v878_v60, %v2360_v47  ;;  %v482_v8 = vadd.f32 %v481_v2, %v480_v59  ;;  %v505_v10 = vadd.f32 %v504_v6, %v503_v3  ;;  %v974_v2 = vld [vmem:[#allocation10] sm:$0xff]  ;;  %v975_v3 = vld [vmem:[#allocation10 + $0x8] sm:$0xff]  ;;  %s1295_s20 = sshll.u32 %s413_s23, 4  ;;  %s2455_s20 = int_to_ptr.vmem [resolvable:$true] %s1295_s20 }
  0xcf   : > { %v500_v7 = vadd.f32 %v499_v1, %v498_v58  ;;  %v446_v11 = vsel %vm438_vm7, %v2333_v17, 0.0  ;;  %vm439_vm8 = vcmp.eq.s32.totalorder %v2326_v14, 3  ;;  %v891_v12 = vsub.f32 %v879_v0, %v883_v57  ;;  %p1871_p5 = scmp.lt.s32.totalorder %s2455_s20, %s1869_s28 }
  0xd0   : > { %v2374_v9 = vadd.f32 %v492_v4, %v491_v61  ;;  %v475_v15 = vadd.f32 %v474_v62, %v473_v50  ;;  %v512_v18 = vsel %vm448_vm0, %v446_v11, 0.0  ;;  %1565 = vmatprep.mubr.msk.f32.mxu1 %vm448_vm0, %v446_v11  ;;  %v483_v20 = vrot.slane %v482_v8, 1 }
  0xd1   : > { %v501_v16 = vrot.slane %v500_v7, 1  ;;  %v506_v13 = vrot.slane %v505_v10, 4  ;;  %v447_v21 = vsel %vm439_vm8, %v422_v37, 0.0  ;;  %v884_v24 = vrot.slane %v2360_v47, 2 }
  0xd2   : > { %v894_v19 = vadd.f32 %v890_v5, %v2374_v9  ;;  %v513_v23 = vsel %vm448_vm0, %v447_v21, 0.0  ;;  %1566 = vmatmul.mubr.msk.f32.gmra.mrb[6].mxu1 %vm448_vm0, %v447_v21  ;;  %v880_v26 = vsub.f32 16.0, %v475_v15  ;;  %v484_v27 = vadd.f32 %v483_v20, %v482_v8 }
  0xd3   : > { %v2381_v22 = vadd.f32 %v501_v16, %v500_v7  ;;  %v507_v17 = vadd.f32 %v506_v13, %v505_v10  ;;  %v514_v14 = vadd.f32 %v513_v23, %v512_v18  ;;  %v885_v34 = vrot.slane %v2360_v47, 3 }
  0xd4   : > { %v892_v35 = vsub.f32 %v880_v26, %v884_v24  ;;  %v881_v36 = vsub.f32 16.0, %v484_v27  ;;  %v898_v4 = vsub.f32 16.0, %v2360_v47  ;;  %vm913_vm10 = vcmask 1042434  }
  0xd5   : > { %v895_v25 = vadd.f32 %v891_v12, %v2381_v22  ;;  %v508_v28 = vrot.slane %v507_v17, 2  ;;  %v515_v29 = vrot.slane %v514_v14, 4  ;;  %v912_v5 = vsel %vm911_vm9, %v2381_v22, %v2374_v9 }
  0xd6   : > { %v893_v41 = vsub.f32 %v881_v36, %v885_v34  ;;  %vm915_vm11 = vcmask 1043459   ;;  %v1586_v6 = vpack.c.bf16 %v975_v3, %v974_v2  ;;  %v918_v8 = vrot.slane %v2360_v47, 4 }
  0xd7   : > { %v924_v30 = vrot.slane %v895_v25, 7  ;;  %v509_v31 = vadd.f32 %v508_v28, %v507_v17  ;;  %v516_v32 = vadd.f32 %v515_v29, %v514_v14  ;;  %v932_v15 = vrot.slane %v898_v4, 4 }
  0xd8   : > { %vm934_vm12 = vcmask 1043456   ;;  %1587 = vmatprep.subr.bf16.mxu0 %v1586_v6  ;;  %vm805_vm13 = vcmask 7168   ;;  %vm808_vm14 = vcmask 15360   ;;  %vm811_vm15 = vcmask 23552  }
  0xd9   : > { %v925_v33 = vsel %vm911_vm9, %v924_v30, %v894_v19  ;;  %v510_v37 = vrot.slane %v509_v31, 1  ;;  %v517_v38 = vrot.slane %v516_v32, 2  ;;  %1589 = vmatpush3.bf16.msra.mxu0 %v1586_v6  ;;  %vm963_vm1 = vcmask 31744  }
  0xda   : > { %vm966_vm2 = vcmask 64512   ;;  %vm969_vm3 = vcmask 97280   ;;  %vm1251_vm4 = vcmask 3072  }
  0xdb   : > { %v511_v39 = vadd.f32 %v510_v37, %v509_v31  ;;  %v518_v40 = vadd.f32 %v517_v38, %v516_v32 }
  0xdd   : > { %v896_v42 = vadd.f32 %v892_v35, %v511_v39  ;;  %v519_v43 = vrot.slane %v518_v40, 1  ;;  %v914_v7 = vsel %vm913_vm10, %v511_v39, %v912_v5 }
  0xdf   : > { %v520_v44 = vadd.f32 %v519_v43, %v518_v40  ;;  %v926_v0 = vrot.slane %v896_v42, 6 }
  0xe1   : > { %v897_v45 = vadd.f32 %v893_v41, %v520_v44  ;;  %v927_v10 = vsel %vm913_vm10, %v926_v0, %v925_v33  ;;  %v916_v11 = vsel %vm915_vm11, %v520_v44, %v914_v7 }
  0xe2   : > { %v935_v16 = vsel %vm934_vm12, %v916_v11, %v918_v8  ;;  %v1058_v8 = vld [vmem:[%s2507_s5 + $0x8] sm:$0xff] }
  0xe3   : > { %v928_v1 = vrot.slane %v897_v45, 5  ;;  %v937_v19 = vmul.f32 0.0625, %v935_v16 }
  0xe5   : > { %v929_v12 = vsel %vm915_vm11, %v928_v1, %v927_v10  ;;  %1572 = vmatprep.mubr.msk.f32.mxu0 %vm448_vm0, %v937_v19 }
  0xe6   : > { %v936_v18 = vsel %vm934_vm12, %v929_v12, %v932_v15  ;;  %v1161_v15 = vlaneseq }
  0xe7   : > { %v938_v20 = vmul.f32 0.0625, %v936_v18 }
  0xe8   : > { %v2435_v16 = vshrl.u32 %v1161_v15, 7 }
  0xe9   : > { %1573 = vmatmul.mubr.msk.f32.vlgmr.msra.gmra.mrb[8].mxu0 %vm448_vm0, %v938_v20 }
  0xea   : > { %v1163_v19 = vsub.s32 7, %v2435_v16  ;;  %vm1264_vm5 = vcmp.eq.s32.totalorder %v2435_v16, 0  ;;  %vm1267_vm6 = vcmp.eq.s32.totalorder %v2435_v16, 1  ;;  %vm1270_vm7 = vcmp.eq.s32.totalorder %v2435_v16, 2 }
  0xeb   : > { %vm1273_vm8 = vcmp.eq.s32.totalorder %v2435_v16, 3  ;;  %vm1276_vm9 = vcmp.eq.s32.totalorder %v2435_v16, 4 }
 0x194   : > { %v2389_v46 = vpop.f32.mrb[0].mxu0 }
 0x195   : > { %v2391_v48 = vpop.f32.mrb[1].mxu0 }
 0x197   : > { %v2393_v51 = vpop.f32.mrb[0].mxu1 }
 0x198   : > { %v1545_v49 = vpop.f32.mrb[2].mxu0  ;;  %v2395_v52 = vpop.f32.mrb[1].mxu1 }
 0x199   : > { %785 = vrot.lane.b32.xlu0 %v1545_v49, %s1970_s27  ;;  %v623_v50 = vpop.f32.mrb[3].mxu0  ;;  %v1057_v49 = vld [vmem:[%s2507_s5] sm:$0xff] }
 0x19a   : > { %1579 = vmatprep.mubr.msk.f32.mxu1 %vm448_vm0, %v1057_v49 }
 0x19b   : > { %v1561_v55 = vpop.f32.mrb[2].mxu1 }
 0x19c   : > { %v1548_v53 = vpop.f32.mrb[4].mxu0  ;;  %v752_v56 = vpop.f32.mrb[3].mxu1 }
 0x19d   : > { %783 = vrot.lane.b32.xlu0 %v623_v50, %s1970_s27  ;;  %793 = vrot.lane.b32.xlu1 %v1548_v53, %s1971_s7  ;;  %v633_v54 = vpop.f32.mrb[5].mxu0 }
 0x19f   : > { %v1564_v59 = vpop.f32.mrb[4].mxu1 }
 0x1a0   : > { %v1551_v57 = vpop.f32.mrb[6].mxu0  ;;  %v762_v60 = vpop.f32.mrb[5].mxu1 }
 0x1a1   : > { %818 = vrot.lane.b32.xlu1 %v1561_v55, %s1970_s27  ;;  %816 = vrot.lane.b32.xlu0 %v752_v56, %s1970_s27  ;;  %v643_v58 = vpop.f32.mrb[7].mxu0 }
 0x1a5   : > { %791 = vrot.lane.b32.xlu1 %v633_v54, %s1971_s7  ;;  %799 = vrot.lane.b32.xlu0 %v643_v58, %s1972_s29  ;;  %v1567_v61 = vpop.f32.mrb[6].mxu1 }
 0x1a6   : > { %v772_v62 = vpop.f32.mrb[7].mxu1 }
 0x1a9   : > { %801 = vrot.lane.b32.xlu1 %v1551_v57, %s1972_s29  ;;  %824 = vrot.lane.b32.xlu0 %v762_v60, %s1971_s7 }
 0x1ad   : > { %826 = vrot.lane.b32.xlu1 %v1564_v59, %s1971_s7  ;;  %832 = vrot.lane.b32.xlu0 %v772_v62, %s1972_s29 }
 0x1b1   : > { %834 = vrot.lane.b32.xlu1 %v1567_v61, %s1972_s29 }
 0x1cb   : > { %846 = vxpose.xlu0.b32.start.end [1/1] (short) (narrow) %v845_v63, 16 }
 0x20b   : > { %v786_v9 = vpop.permute.xlu0 %785 }
 0x20c   : > { %v807_v26 = vsel %vm805_vm13, %v2389_v46, %v786_v9 }
 0x20f   : > { %v784_v13 = vpop.permute.xlu0 %783  ;;  %v794_v21 = vpop.permute.xlu1 %793 }
 0x210   : > { %v810_v28 = vsel %vm808_vm14, %v807_v26, %v794_v21  ;;  %v806_v30 = vsel %vm805_vm13, %v2391_v48, %v784_v13 }
 0x213   : > { %v817_v22 = vpop.permute.xlu0 %816  ;;  %v819_v47 = vpop.permute.xlu1 %818 }
 0x214   : > { %v839_v39 = vsel %vm805_vm13, %v2393_v51, %v819_v47  ;;  %v838_v45 = vsel %vm805_vm13, %v2395_v52, %v817_v22  ;;  %v1976_v51 = vmov 15   ;;  %v1574_v52 = vpop.f32.mrb[8].mxu0 }
 0x215   : > { %1708 = vset.pattern.permute.xlu0 %v1976_v51  ;;  %1709 = vset.pattern.permute.xlu1 %v1976_v51  ;;  %v2426_v54 = vpop.f32.mrb[9].mxu0  ;;  %v1141_v18 = vadd.f32 0.5, %v1574_v52 }
 0x216   : > { %v1140_v55 = vadd.f32 0.5, %v2426_v54 }
 0x217   : > { %v800_v23 = vpop.permute.xlu0 %799  ;;  %v792_v17 = vpop.permute.xlu1 %791 }
 0x218   : > { %v809_v32 = vsel %vm808_vm14, %v806_v30, %v792_v17  ;;  %1710 = vrcp.f32 %v1140_v55  ;;  %v1243_v17 = vrot.slane %v1141_v18, 4 }
 0x219   : > { %v812_v35 = vsel %vm811_vm15, %v809_v32, %v800_v23 }
 0x21a   : > { %v899_v40 = vsub.f32 16.0, %v812_v35 }
 0x21b   : > { %v825_v14 = vpop.permute.xlu0 %824  ;;  %v802_v24 = vpop.permute.xlu1 %801 }
 0x21c   : > { %v813_v31 = vsel %vm811_vm15, %v810_v28, %v802_v24  ;;  %v840_v46 = vsel %vm808_vm14, %v838_v45, %v825_v14 }
 0x21d   : > { %v900_v34 = vsub.f32 16.0, %v813_v31 }
 0x21f   : > { %v833_v25 = vpop.permute.xlu0 %832  ;;  %v827_v29 = vpop.permute.xlu1 %826 }
 0x220   : > { %v841_v41 = vsel %vm808_vm14, %v839_v39, %v827_v29  ;;  %v842_v48 = vsel %vm811_vm15, %v840_v46, %v833_v25 }
 0x222   : > { %v1711_v59 = vpop.eup %1710 }
 0x223   : > { %v835_v36 = vpop.permute.xlu1 %834  ;;  %1149 = vperm.xlu0 %1708, %v1711_v59  }
 0x224   : > { %v843_v42 = vsel %vm811_vm15, %v841_v41, %v835_v36 }
 0x24b   : > { %v862_v27 = vpop.trf.xlu0 }
 0x24c   : > { %941 = vrot.lane.b32.xlu1 %v862_v27, %s1973_s4  ;;  %v905_v37 = vsub.f32 16.0, %v862_v27  ;;  %v901_v43 = vsub.f32 %v899_v40, %v862_v27  ;;  %v1245_v27 = vsub.f32 %v1141_v18, %v1243_v17 }
 0x24e   : > { %v903_v50 = vadd.f32 %v901_v43, %v842_v48  ;;  %v1246_v28 = vand.u32 2147483647, %v1245_v27 }
 0x24f   : > { %v863_v33 = vpop.trf.xlu0 }
 0x250   : > { %943 = vrot.lane.b32.xlu1 %v863_v33, %s1973_s4  ;;  %v902_v38 = vsub.f32 %v900_v34, %v863_v33  ;;  %v906_v53 = vsub.f32 16.0, %v863_v33  ;;  %s2555_s4 = sld [smem:[#allocation24_spill]] }
 0x252   : > { %v904_v44 = vadd.f32 %v902_v38, %v843_v42 }
 0x254   : > { %957 = vrot.lane.b32.xlu1 %v905_v37, %s1974_s17 }
 0x258   : > { %951 = vrot.lane.b32.xlu1 %v904_v44, %s1975_s11 }
 0x25c   : > { %949 = vrot.lane.b32.xlu1 %v903_v50, %s1975_s11  ;;  %s1864_s11 = scalar_lea.vmem %s2455_s20, 128 }
 0x25d   : > { %p1865_p10 = scmp.ne.s32.totalorder %s2455_s20, %s1864_s11  ;;  %p1872_p9 = scmp.lt.s32.totalorder %s1870_s6, %s1864_s11 }
 0x25f   : > { %p1866_p3 = pnand %p1865_p10, %p2556_p13  ;;  %p1873_p8 = por %p1872_p9, %p1871_p5 }
 0x260   : > { %959 = vrot.lane.b32.xlu1 %v906_v53, %s1974_s17  ;;  %s2453_s17 = scalar_lea.hbm %s2555_s4, %s1499_s21 }
 0x261   : > { %p1867_p11 = pneg %p1866_p3 }
 0x263   : > { %p1874_p7 = pnand %p1873_p8, %p1867_p11 }
 0x2a2   : > { %v1150_v34 = vpop.permute.xlu0 %1149 }
 0x2a3   : > { %v1157_v36 = vmul.f32 %v1150_v34, %v2426_v54 }
 0x2a5   : > { %v1168_v37 = vrot.slane %v1157_v36, 4 }
 0x2a7   : > { %v1170_v38 = vsub.f32 %v1157_v36, %v1168_v37 }
 0x2a9   : > { %v1171_v39 = vand.u32 2147483647, %v1170_v38 }
 0x2be   : > { %v942_v56 = vpop.permute.xlu1 %941 }
 0x2bf   : > { %v964_v61 = vsel %vm963_vm1, %v842_v48, %v942_v56 }
 0x2c2   : > { %v944_v57 = vpop.permute.xlu1 %943 }
 0x2c3   : > { %v965_v0 = vsel %vm963_vm1, %v843_v42, %v944_v57 }
 0x2c6   : > { %v958_v58 = vpop.permute.xlu1 %957 }
 0x2ca   : > { %v952_v60 = vpop.permute.xlu1 %951 }
 0x2cb   : > { %v968_v2 = vsel %vm966_vm2, %v965_v0, %v952_v60 }
 0x2ce   : > { %v950_v62 = vpop.permute.xlu1 %949 }
 0x2cf   : > { %v967_v63 = vsel %vm966_vm2, %v964_v61, %v950_v62 }
 0x2d0   : > { %v970_v1 = vsel %vm969_vm3, %v967_v63, %v958_v58 }
 0x2d1   : > { %v972_v5 = vmul.f32 0.0625, %v970_v1 }
 0x2d2   : > { %v960_v3 = vpop.permute.xlu1 %959 }
 0x2d3   : > { %v971_v4 = vsel %vm969_vm3, %v968_v2, %v960_v3 }
 0x2d4   : > { %v973_v6 = vmul.f32 0.0625, %v971_v4 }
 0x2d6   : > { %v1590_v7 = vpack.c.bf16 %v973_v6, %v972_v5 }
 0x2d8   : > { %1591 = vmatprep.subr.bf16.mxu1 %v1590_v7 }
 0x2d9   : > { %1593 = vmatpush3.bf16.msra.mxu1 %v1590_v7 }
 0x2dc   : > { %1580 = vmatmul.mubr.msk.f32.vlgmr.msra.gmra.mrb[8].mxu1 %vm448_vm0, %v1058_v8  ;;  %vm1172_vm0 = vcmask 125952  }
 0x2dd   : > { %v1173_v40 = vsel %vm1172_vm0, %v1171_v39, 0.0 }
 0x3af   : > { %v1581_v10 = vpop.f32.mrb[8].mxu1 }
 0x3b0   : > { %v1142_v11 = vadd.f32 0.5, %v1581_v10  ;;  %v1131_v12 = vpop.f32.mrb[9].mxu1 }
 0x3b2   : > { %1712 = vrcp.f32 %v1142_v11 }
 0x3b3   : > { %1714 = vrcp.f32 %v1141_v18 }
 0x3bc   : > { %v1713_v20 = vpop.eup %1712 }
 0x3bd   : > { %v1164_v9 = vrot.slane %v1713_v20, %v1163_v19  ;;  %v1715_v22 = vpop.eup %1714 }
 0x3bf   : > { %v1165_v13 = vmul.f32 %v1164_v9, %v1131_v12  ;;  %v1166_v21 = vmul.f32 %v1581_v10, %v1164_v9 }
 0x3c1   : > { %1200 = vrot.lane.b32.xlu1 %v1165_v13, %s1977_s13 }
 0x3c5   : > { %1202 = vrot.lane.b32.xlu1 %v1166_v21, %s1977_s13 }
 0x3c9   : > { %1154 = vperm.xlu1 %1709, %v1715_v22  }
 0x433   : > { %v1201_v47 = vpop.permute.xlu1 %1200 }
 0x434   : > { %v1206_v23 = vsub.f32 %v1165_v13, %v1201_v47 }
 0x436   : > { %v1208_v14 = vand.u32 2147483647, %v1206_v23 }
 0x437   : > { %v1203_v24 = vpop.permute.xlu1 %1202 }
 0x438   : > { %v1207_v25 = vsub.f32 %v1166_v21, %v1203_v24  ;;  %1224 = vrot.lane.b32.xlu1 %v1208_v14, %s1978_s1  ;;  %v1210_v42 = vsel %vm963_vm1, %v1208_v14, 0.0 }
 0x43a   : > { %v1209_v26 = vand.u32 2147483647, %v1207_v25 }
 0x43c   : > { %1226 = vrot.lane.b32.xlu1 %v1209_v26, %s1978_s1  ;;  %v1211_v41 = vsel %vm963_vm1, %v1209_v26, 0.0 }
 0x43d   : > { %v1212_v43 = vadd.f32 %v1211_v41, %v1210_v42 }
 0x440   : > { %1248 = vrot.lane.b32.xlu1 %v1246_v28, %s1979_s16 }
 0x448   : > { %v1155_v29 = vpop.permute.xlu1 %1154 }
 0x449   : > { %v1158_v30 = vmul.f32 %v1574_v52, %v1155_v29 }
 0x44b   : > { %v1184_v31 = vrot.slane %v1158_v30, 4 }
 0x44d   : > { %v1186_v32 = vsub.f32 %v1158_v30, %v1184_v31 }
 0x44f   : > { %v1187_v33 = vand.u32 2147483647, %v1186_v32 }
 0x451   : > { %v1188_v35 = vsel %vm1172_vm0, %v1187_v33, 0.0 }
 0x452   : > { %1189 = vadd.xlane.f32.xlu0 %v1188_v35 }
 0x464   : > { %1174 = vadd.xlane.f32.xlu1 %v1173_v40 }
 0x468   : > { %1213 = vadd.xlane.f32.xlu1 %v1212_v43 }
 0x4aa   : > { %v1225_v44 = vpop.permute.xlu1 %1224 }
 0x4ab   : > { %v1230_v46 = vsel %vm963_vm1, %v1225_v44, 0.0 }
 0x4ae   : > { %v1227_v45 = vpop.permute.xlu1 %1226 }
 0x4af   : > { %v1231_v48 = vsel %vm963_vm1, %v1227_v45, 0.0 }
 0x4b0   : > { %v1232_v49 = vadd.f32 %v1231_v48, %v1230_v46 }
 0x4b2   : > { %v1249_v50 = vpop.permute.xlu1 %1248  ;;  %1233 = vadd.xlane.f32.xlu1 %v1232_v49 }
 0x4b3   : > { %v1252_v51 = vsel %vm1251_vm4, %v1249_v50, 0.0 }
 0x4b6   : > { %1253 = vadd.xlane.f32.xlu1 %v1252_v51 }
 0x4df   : > { %v1190_v53 = vpop.xlane.xlu0 %1189 }
 0x4e0   : > { %v1191_v52 = vrot.slane %v1190_v53, 4 }
 0x4e2   : > { %v1192_v54 = vadd.f32 %v1191_v52, %v1190_v53 }
 0x4e4   : > { %v1193_v55 = vrot.slane %v1192_v54, 2 }
 0x4e6   : > { %v1194_v59 = vadd.f32 %v1193_v55, %v1192_v54 }
 0x4e8   : > { %v1195_v1 = vrot.slane %v1194_v59, 1 }
 0x4ea   : > { %v1196_v6 = vadd.f32 %v1195_v1, %v1194_v59 }
 0x4f1   : > { %v1175_v56 = vpop.xlane.xlu1 %1174 }
 0x4f2   : > { %v1176_v57 = vrot.slane %v1175_v56, 4 }
 0x4f4   : > { %v1177_v58 = vadd.f32 %v1176_v57, %v1175_v56 }
 0x4f5   : > { %v1214_v60 = vpop.xlane.xlu1 %1213 }
 0x4f6   : > { %v1178_v61 = vrot.slane %v1177_v58, 2  ;;  %v1215_v62 = vrot.slane %v1214_v60, 4 }
 0x4f8   : > { %v1216_v63 = vadd.f32 %v1215_v62, %v1214_v60  ;;  %v1179_v0 = vadd.f32 %v1178_v61, %v1177_v58 }
 0x4fa   : > { %v1217_v2 = vrot.slane %v1216_v63, 2  ;;  %v1180_v3 = vrot.slane %v1179_v0, 1 }
 0x4fc   : > { %v1181_v4 = vadd.f32 %v1180_v3, %v1179_v0  ;;  %v1218_v5 = vadd.f32 %v1217_v2, %v1216_v63 }
 0x4fe   : > { %1594 = vpush %v1181_v4  ;;  %v1219_v7 = vrot.slane %v1218_v5, 1 }
 0x4ff   : > { %1596 = vpush %v1196_v6 }
 0x500   : > { %v1220_v8 = vadd.f32 %v1219_v7, %v1218_v5 }
 0x502   : > { %1598 = vpush %v1220_v8 }
 0x52f   : > { %s1595_s15 = spop %1594 }
 0x530   : > { %s1597_s10 = spop %1596  ;;  %v1265_v14 = vstv %s1595_s15 }
 0x531   : > { %v1266_v25 = vsel %vm1264_vm5, %v1265_v14, 0.0  ;;  %v1271_v28 = vstv %s1597_s10 }
 0x533   : > { %s1599_s19 = spop %1598 }
 0x534   : > { %v1268_v24 = vstv %s1599_s19 }
 0x535   : > { %v1269_v26 = vsel %vm1267_vm6, %v1268_v24, %v1266_v25 }
 0x536   : > { %v1272_v29 = vsel %vm1270_vm7, %v1271_v28, %v1269_v26 }
 0x53f   : > { %v1234_v10 = vpop.xlane.xlu1 %1233 }
 0x540   : > { %v1235_v11 = vrot.slane %v1234_v10, 4 }
 0x542   : > { %v1236_v12 = vadd.f32 %v1235_v11, %v1234_v10 }
 0x543   : > { %v1254_v15 = vpop.xlane.xlu1 %1253 }
 0x544   : > { %v1237_v18 = vrot.slane %v1236_v12, 2  ;;  %v1255_v19 = vrot.slane %v1254_v15, 4 }
 0x546   : > { %v1256_v20 = vadd.f32 %v1255_v19, %v1254_v15  ;;  %v1238_v9 = vadd.f32 %v1237_v18, %v1236_v12 }
 0x548   : > { %v1257_v13 = vrot.slane %v1256_v20, 2  ;;  %v1239_v21 = vrot.slane %v1238_v9, 1 }
 0x54a   : > { %v1258_v22 = vadd.f32 %v1257_v13, %v1256_v20  ;;  %v1240_v47 = vadd.f32 %v1239_v21, %v1238_v9 }
 0x54c   : > { %1600 = vpush %v1240_v47  ;;  %v1259_v23 = vrot.slane %v1258_v22, 1 }
 0x54e   : > { %v1260_v17 = vadd.f32 %v1259_v23, %v1258_v22 }
 0x550   : > { %1602 = vpush %v1260_v17 }
 0x57d   : > { %s1601_s9 = spop %1600 }
 0x57e   : > { %v1274_v27 = vstv %s1601_s9 }
 0x57f   : > { %v1275_v30 = vsel %vm1273_vm8, %v1274_v27, %v1272_v29 }
 0x581   : > { %s1603_s27 = spop %1602 }
 0x582   : > { %v1277_v31 = vstv %s1603_s27 }
 0x583   : > { %v1278_v32 = vsel %vm1276_vm9, %v1277_v31, %v1275_v30 }
 0x584   : > { %1279 = vst [vmem:[%s413_s23] sm:$0xff] %v1278_v32 }
 0x585   : > { %1877 = shalt.err (!%p1874_p7)
}
 0x586   : > { %s1878_s12 = scalar_lea.hbm %s2453_s17, 128  ;;  %s1882_s1 = scalar_lea.hbm %s2555_s4, 256 }
 0x587   : > { %p1879_p4 = scmp.ne.s32.totalorder %s2453_s17, %s1878_s12  ;;  %p1883_p0 = scmp.lt.u32.totalorder %s2453_s17, %s2555_s4 }
 0x588   : > { %p1884_p12 = scmp.lt.u32.totalorder %s1882_s1, %s1878_s12  ;;  %p1886_p10 = scmp.lt.u32.totalorder %s1878_s12, %s2453_s17 }
 0x589   : > { %p1880_p6 = pnand %p1879_p4, %p2556_p13 }
 0x58a   : > { %p1885_p2 = por %p1884_p12, %p1883_p0 }
 0x58b   : > { %p1881_p1 = pneg %p1880_p6 }
 0x58c   : > { %p1887_p3 = por %p1886_p10, %p1885_p2 }
 0x58e   : > { %p1888_p11 = pnand %p1887_p3, %p1881_p1 }
 0x590   : > { %1891 = shalt.err (!%p1888_p11)
}
 0x591   : > { %1616 = dma.vmem_to_hbm [thread:$0]  (%p2556_p13), %s2455_s20, 128, %s2453_s17, %s1281_s24  }
 0x592 PF: > { %s2557_s10 = sld [smem:[#allocation17_spill]]  ;;  %s2558_s19 = sld [smem:[#allocation19_spill]] }
 0x593   : > { %p2560_p9 = scmp.ge.s32.totalorder %s1958_s26, 2 }
 0x598   : > { %s1307_s30 = sand.u32 1, %s2557_s10   ;;  %p2559_p5 = scmp.ne.s32.totalorder %s2558_s19, 0 }
 0x599   : > { %s1308_s9 = scalar_lea.sflag [#allocation4], %s1307_s30 }
 0x59a   : > { %p1636_p8 = pnand %p2560_p9, %p2559_p5 }
 0x59c   : > { %1933 = dma.done.wait (!%p1636_p8), %s1308_s9, 128  }
 0x59d   : > { %1935 = vsyncadd (!%p1636_p8), %s1308_s9, 4294967168  ;;  %s28_s26 = sadd.s32 1, %s1958_s26   ;;  %s2561_s23 = sld [smem:[#allocation18_spill]] }
 0x59e   : > { %p25_p7 = scmp.ge.s32.totalorder %s28_s26, 4   ;;  %s2562_s8 = sld [smem:[#allocation21_spill]] }
 0x59f   : > { %s2563_s27 = sld [smem:[#allocation20_spill]]  ;;  %s2564_s21 = smov %s1942_s22 }
 0x5a0   : > { %s2567_s24 = smov %s1954_s25  ;;  %27 = sbr.rel (!%p25_p7) target bundleno = 14 (0xe), region = 132 }
 0x5a3   : > { %s2565_s22 = smov %s2561_s23 }
 0x5a4   : > { %s2566_s23 = smov %s2562_s8 }
 0x5a5   : > { %s2568_s25 = smov %s2563_s27 }
 0x5a7   :  { %1313 = vsyncpa [#allocation3], 1 }
 0x5a8   :  { %1315 = vsyncpa [#allocation3 + $0x1], 1 }
 0x5a9   :  { %1316 = vsyncpa [#allocation6], 1 }
 0x5aa   :  { %1318 = vsyncpa [#allocation6 + $0x1], 1 }
 0x5ab   :  { %1319 = vsyncpa [#allocation9], 1 }
 0x5ac   :  { %1321 = vsyncpa [#allocation9 + $0x1], 1 }
 0x5ad   :  { %1322 = vsyncpa [#allocation4], 1 }
 0x5ae   :  { %1324 = vsyncpa [#allocation4 + $0x1], 1 }

</bundles_post_ra>
